<compile_context>
chip_gen: v5e
topology: v5e:2x2
jax: 0.10.0
libtpu: 0.0.40
codegen_flags: <defaults>
</compile_context>

<pallas_src>
import jax
import jax.numpy as jnp
from jax.experimental import pallas as pl
from jax.experimental.pallas import tpu as pltpu

DT = 0.05  # module's `dt` hyper-parameter


def _make_rk4_kernel(dt: float, num_steps: int, n_chunks: int, tanh_dtype):
    half_dt = 0.5 * dt

    def kernel(u_ref, w1_ref, b1_ref, w2_ref, b2_ref, o_ref):
        tb = u_ref.shape[0]
        cs = tb // n_chunks

        w1 = w1_ref[...]                               # (D, H), possibly bf16
        w2 = w2_ref[...]                               # (H, D), possibly bf16
        b1 = b1_ref[...].astype(jnp.float32)           # (1, H) -- implicit broadcast in add
        b2 = b2_ref[...].astype(jnp.float32)           # (1, D)

        def model(x):
            # MXU fed in the weights' dtype (bf16-native path), f32 accumulation.
            h_pre = (jnp.dot(x.astype(w1.dtype), w1,
                             preferred_element_type=jnp.float32) + b1)
            # tanh in bf16 when weights are bf16 (EUP bf16 path; next matmul wants bf16 anyway).
            h = jnp.tanh(h_pre.astype(tanh_dtype))
            return (jnp.dot(h.astype(w2.dtype), w2,
                            preferred_element_type=jnp.float32) + b2)

        def rk4(u):
            # Exactly mirrors the PyTorch forward (including its u + dt*k1 stage).
            k1 = model(u)
            u1 = u + dt * k1
            k2 = model(u1)
            u2 = u + half_dt * k2
            k3 = model(u2)
            u3 = u + half_dt * k3
            k4 = model(u3)
            k = (k1 + 2.0 * k2 + 2.0 * k3 + k4) * (1.0 / 6.0)
            return u + dt * k

        # Independent sub-chunk chains in the same basic block -> MXU/EUP/VPU overlap.
        chunks = tuple(
            u_ref[pl.ds(c * cs, cs), :].astype(jnp.float32) for c in range(n_chunks)
        )

        def step(_, cks):
            return tuple(rk4(c) for c in cks)

        chunks = jax.lax.fori_loop(0, num_steps, step, chunks, unroll=False)

        for c in range(n_chunks):
            o_ref[pl.ds(c * cs, cs), :] = chunks[c].astype(o_ref.dtype)

    return kernel


def rk4_step(u, w1, b1, w2, b2, *, dt=DT, num_steps=1, batch_tile=None, n_chunks=None):
    """Apply `num_steps` fused RK4 steps of the MLP dynamics. u: [B, D] -> [B, D]."""
    B, D = u.shape
    H = w1.shape[1]

    # --- tile selection: biggest practical tile; fewer grid steps ---------------
    if batch_tile is None:
        if B <= 4096:
            batch_tile = B
        else:
            batch_tile = next((t for t in range(4096, 7, -8) if B % t == 0), B)
    tb = batch_tile
    assert B % tb == 0, "batch must be divisible by batch_tile"
    # (8,128) BlockSpec constraint: second-to-last dim must be a multiple of 8
    # unless the block spans the full array extent.
    assert tb == B or tb % 8 == 0, "batch_tile must be a multiple of 8 (or equal B)"

    # --- in-kernel sub-chunking (breaks the serial k1->k4 chain) ----------------
    if n_chunks is None:
        n_chunks = 2 if (tb % 16 == 0) else 1
    assert tb % n_chunks == 0
    cs = tb // n_chunks
    assert n_chunks == 1 or cs % 8 == 0, "sub-chunk rows must be a multiple of 8"

    grid = (B // tb,)
    b1r = b1.reshape(1, H)
    b2r = b2.reshape(1, D)

    # tanh in weight dtype when the weights are low precision (bf16 on v6e/v7x).
    w_dtype = jnp.dtype(w2.dtype)
    tanh_dtype = w_dtype if (w_dtype.itemsize < 4 and
                             jnp.issubdtype(w_dtype, jnp.floating)) else jnp.float32

    w_itemsize = jnp.dtype(w1.dtype).itemsize
    cost = pl.CostEstimate(
        flops=num_steps * 8 * 2 * B * D * H,            # 8 matmuls per RK4 step
        transcendentals=num_steps * 4 * B * H,          # 4 tanh evaluations per step
        bytes_accessed=(2 * B * D * 4                   # u in + out (f32)
                        + (D * H + H * D) * w_itemsize  # weights
                        + (H + D) * 4),                 # biases
    )

    return pl.pallas_call(
        _make_rk4_kernel(dt, num_steps, n_chunks, tanh_dtype),
        out_shape=jax.ShapeDtypeStruct((B, D), u.dtype),
        grid=grid,
        in_specs=[
            pl.BlockSpec((tb, D), lambda i: (i, 0)),    # u: tiled over batch
            pl.BlockSpec((D, H), lambda i: (0, 0)),     # weights stay VMEM-resident
            pl.BlockSpec((1, H), lambda i: (0, 0)),
            pl.BlockSpec((H, D), lambda i: (0, 0)),
            pl.BlockSpec((1, D), lambda i: (0, 0)),
        ],
        out_specs=pl.BlockSpec((tb, D), lambda i: (i, 0)),
        input_output_aliases={0: 0},                    # write result over u's buffer
        cost_estimate=cost,
        compiler_params=pltpu.CompilerParams(
            dimension_semantics=("parallel",),          # shard batch tiles across TCs (v7x)
        ),
    )(u, w1, b1r, w2, b2r)


def rk4_reference(u, w1, b1, w2, b2, dt=DT):
    def model(x):
        return jnp.tanh(x @ w1 + b1) @ w2 + b2

    k1 = model(u)
    u1 = u + dt * k1
    k2 = model(u1)
    u2 = u + 0.5 * dt * k2
    k3 = model(u2)
    u3 = u + 0.5 * dt * k3
    k4 = model(u3)
    k = (k1 + 2.0 * k2 + 2.0 * k3 + k4) / 6.0
    return u + dt * k


if __name__ == "__main__":
    B, D, H = 256, 128, 128   # [batch, state_dim]; MLP hidden = H

    key = jax.random.PRNGKey(0)
    ku, ka, kb, kc, kd = jax.random.split(key, 5)
    u = jax.random.normal(ku, (B, D), dtype=jnp.float32)
    w1 = jax.random.normal(ka, (D, H), dtype=jnp.float32) / jnp.sqrt(D)
    b1 = jax.random.normal(kb, (H,), dtype=jnp.float32) * 0.01
    w2 = jax.random.normal(kc, (H, D), dtype=jnp.float32) / jnp.sqrt(H)
    b2 = jax.random.normal(kd, (D,), dtype=jnp.float32) * 0.01

    rk4_jit = jax.jit(
        rk4_step, static_argnames=("dt", "num_steps", "batch_tile", "n_chunks"))

    # 1) f32 weights: matches the module's forward (single RK4 step) tightly.
    out = jax.block_until_ready(rk4_jit(u, w1, b1, w2, b2))
    ref = rk4_reference(u, w1, b1, w2, b2)
    assert out.shape == (B, D) and out.dtype == jnp.float32
    assert jnp.allclose(out, ref, atol=1e-4, rtol=1e-4), "f32 mismatch vs reference"

    # 2) bf16 weights feeding the MXU natively (f32 accumulation, bf16 tanh): looser tol.
    w1b, w2b = w1.astype(jnp.bfloat16), w2.astype(jnp.bfloat16)
    out_bf = jax.block_until_ready(rk4_jit(u, w1b, b1, w2b, b2))
    assert jnp.allclose(out_bf, ref, atol=2e-2, rtol=2e-2), "bf16 mismatch vs reference"

    # 3) fused 4-step rollout: weights + state stay VMEM-resident, single launch.
    out4 = jax.block_until_ready(rk4_jit(u, w1b, b1, w2b, b2, num_steps=4))
    ref4 = u
    for _ in range(4):
        ref4 = rk4_reference(ref4, w1, b1, w2, b2)
    assert jnp.allclose(out4, ref4, atol=5e-2, rtol=5e-2), "rollout mismatch vs reference"

    # 4) explicit multi-tile grid path (tb < B, multiple of 8) still correct.
    out_t = jax.block_until_ready(rk4_jit(u, w1, b1, w2, b2, batch_tile=128))
    assert jnp.allclose(out_t, ref, atol=1e-4, rtol=1e-4), "tiled mismatch vs reference"

    print("KERNEL_OK")
</pallas_src>

<mosaic_0001>
module attributes {stable_mosaic.version = 11 : i64} {
  func.func @kernel(%arg0: i32, %arg1: memref<256x128xf32, #tpu.memory_space<vmem>>, %arg2: memref<128x128xf32, #tpu.memory_space<vmem>>, %arg3: memref<1x128xf32, #tpu.memory_space<vmem>>, %arg4: memref<128x128xf32, #tpu.memory_space<vmem>>, %arg5: memref<1x128xf32, #tpu.memory_space<vmem>>, %arg6: memref<256x128xf32, #tpu.memory_space<vmem>>) attributes {dimension_semantics = [#tpu.dimension_semantics<parallel>], iteration_bounds = array<i64: 1>, scalar_prefetch = 0 : i64, scratch_operands = 0 : i64, tpu.core_type = #tpu.core_type<tc>, window_params = [{transform_indices = @transform_0, window_bounds = array<i64: 256, 128>}, {pipeline_mode = #tpu.pipeline_mode<synchronous>, transform_indices = @transform_1, window_bounds = array<i64: 128, 128>}, {pipeline_mode = #tpu.pipeline_mode<synchronous>, transform_indices = @transform_2, window_bounds = array<i64: 1, 128>}, {pipeline_mode = #tpu.pipeline_mode<synchronous>, transform_indices = @transform_3, window_bounds = array<i64: 128, 128>}, {pipeline_mode = #tpu.pipeline_mode<synchronous>, transform_indices = @transform_4, window_bounds = array<i64: 1, 128>}, {transform_indices = @transform_5, window_bounds = array<i64: 256, 128>}]} {
    %c0 = arith.constant 0 : index
    %c0_0 = arith.constant 0 : index
    %0 = vector.load %arg2[%c0, %c0_0] : memref<128x128xf32, #tpu.memory_space<vmem>>, vector<128x128xf32>
    %c0_1 = arith.constant 0 : index
    %c0_2 = arith.constant 0 : index
    %1 = vector.load %arg4[%c0_1, %c0_2] : memref<128x128xf32, #tpu.memory_space<vmem>>, vector<128x128xf32>
    %c0_3 = arith.constant 0 : index
    %c0_4 = arith.constant 0 : index
    %2 = vector.load %arg3[%c0_3, %c0_4] : memref<1x128xf32, #tpu.memory_space<vmem>>, vector<1x128xf32>
    %c0_5 = arith.constant 0 : index
    %c0_6 = arith.constant 0 : index
    %3 = vector.load %arg5[%c0_5, %c0_6] : memref<1x128xf32, #tpu.memory_space<vmem>>, vector<1x128xf32>
    %c0_7 = arith.constant 0 : index
    %c0_8 = arith.constant 0 : index
    %4 = vector.load %arg1[%c0_7, %c0_8] : memref<256x128xf32, #tpu.memory_space<vmem>>, vector<128x128xf32>
    %c128 = arith.constant 128 : index
    %c0_9 = arith.constant 0 : index
    %5 = vector.load %arg1[%c128, %c0_9] : memref<256x128xf32, #tpu.memory_space<vmem>>, vector<128x128xf32>
    %c0_i32 = arith.constant 0 : i32
    %cst = arith.constant dense<0.000000e+00> : vector<128x128xf32>
    %6 = tpu.matmul %4, %0, %cst {dimension_numbers = #tpu.dot_dimension_numbers<[1], [0], [0], [1], [0, 0, 1, 1], [], []>} : vector<128x128xf32>, vector<128x128xf32>, vector<128x128xf32> -> vector<128x128xf32>
    %7 = vector.broadcast %2 : vector<1x128xf32> to vector<128x128xf32>
    %8 = arith.addf %6, %7 : vector<128x128xf32>
    %9 = math.tanh %8 : vector<128x128xf32>
    %cst_10 = arith.constant dense<0.000000e+00> : vector<128x128xf32>
    %10 = tpu.matmul %9, %1, %cst_10 {dimension_numbers = #tpu.dot_dimension_numbers<[1], [0], [0], [1], [0, 0, 1, 1], [], []>} : vector<128x128xf32>, vector<128x128xf32>, vector<128x128xf32> -> vector<128x128xf32>
    %11 = vector.broadcast %3 : vector<1x128xf32> to vector<128x128xf32>
    %12 = arith.addf %10, %11 : vector<128x128xf32>
    %cst_11 = arith.constant 5.000000e-02 : f32
    %13 = vector.broadcast %cst_11 : f32 to vector<128x128xf32>
    %14 = arith.mulf %13, %12 : vector<128x128xf32>
    %15 = arith.addf %4, %14 : vector<128x128xf32>
    %cst_12 = arith.constant dense<0.000000e+00> : vector<128x128xf32>
    %16 = tpu.matmul %15, %0, %cst_12 {dimension_numbers = #tpu.dot_dimension_numbers<[1], [0], [0], [1], [0, 0, 1, 1], [], []>} : vector<128x128xf32>, vector<128x128xf32>, vector<128x128xf32> -> vector<128x128xf32>
    %17 = vector.broadcast %2 : vector<1x128xf32> to vector<128x128xf32>
    %18 = arith.addf %16, %17 : vector<128x128xf32>
    %19 = math.tanh %18 : vector<128x128xf32>
    %cst_13 = arith.constant dense<0.000000e+00> : vector<128x128xf32>
    %20 = tpu.matmul %19, %1, %cst_13 {dimension_numbers = #tpu.dot_dimension_numbers<[1], [0], [0], [1], [0, 0, 1, 1], [], []>} : vector<128x128xf32>, vector<128x128xf32>, vector<128x128xf32> -> vector<128x128xf32>
    %21 = vector.broadcast %3 : vector<1x128xf32> to vector<128x128xf32>
    %22 = arith.addf %20, %21 : vector<128x128xf32>
    %cst_14 = arith.constant 2.500000e-02 : f32
    %23 = vector.broadcast %cst_14 : f32 to vector<128x128xf32>
    %24 = arith.mulf %23, %22 : vector<128x128xf32>
    %25 = arith.addf %4, %24 : vector<128x128xf32>
    %cst_15 = arith.constant dense<0.000000e+00> : vector<128x128xf32>
    %26 = tpu.matmul %25, %0, %cst_15 {dimension_numbers = #tpu.dot_dimension_numbers<[1], [0], [0], [1], [0, 0, 1, 1], [], []>} : vector<128x128xf32>, vector<128x128xf32>, vector<128x128xf32> -> vector<128x128xf32>
    %27 = vector.broadcast %2 : vector<1x128xf32> to vector<128x128xf32>
    %28 = arith.addf %26, %27 : vector<128x128xf32>
    %29 = math.tanh %28 : vector<128x128xf32>
    %cst_16 = arith.constant dense<0.000000e+00> : vector<128x128xf32>
    %30 = tpu.matmul %29, %1, %cst_16 {dimension_numbers = #tpu.dot_dimension_numbers<[1], [0], [0], [1], [0, 0, 1, 1], [], []>} : vector<128x128xf32>, vector<128x128xf32>, vector<128x128xf32> -> vector<128x128xf32>
    %31 = vector.broadcast %3 : vector<1x128xf32> to vector<128x128xf32>
    %32 = arith.addf %30, %31 : vector<128x128xf32>
    %cst_17 = arith.constant 2.500000e-02 : f32
    %33 = vector.broadcast %cst_17 : f32 to vector<128x128xf32>
    %34 = arith.mulf %33, %32 : vector<128x128xf32>
    %35 = arith.addf %4, %34 : vector<128x128xf32>
    %cst_18 = arith.constant dense<0.000000e+00> : vector<128x128xf32>
    %36 = tpu.matmul %35, %0, %cst_18 {dimension_numbers = #tpu.dot_dimension_numbers<[1], [0], [0], [1], [0, 0, 1, 1], [], []>} : vector<128x128xf32>, vector<128x128xf32>, vector<128x128xf32> -> vector<128x128xf32>
    %37 = vector.broadcast %2 : vector<1x128xf32> to vector<128x128xf32>
    %38 = arith.addf %36, %37 : vector<128x128xf32>
    %39 = math.tanh %38 : vector<128x128xf32>
    %cst_19 = arith.constant dense<0.000000e+00> : vector<128x128xf32>
    %40 = tpu.matmul %39, %1, %cst_19 {dimension_numbers = #tpu.dot_dimension_numbers<[1], [0], [0], [1], [0, 0, 1, 1], [], []>} : vector<128x128xf32>, vector<128x128xf32>, vector<128x128xf32> -> vector<128x128xf32>
    %41 = vector.broadcast %3 : vector<1x128xf32> to vector<128x128xf32>
    %42 = arith.addf %40, %41 : vector<128x128xf32>
    %cst_20 = arith.constant 2.000000e+00 : f32
    %43 = vector.broadcast %cst_20 : f32 to vector<128x128xf32>
    %44 = arith.mulf %43, %22 : vector<128x128xf32>
    %45 = arith.addf %12, %44 : vector<128x128xf32>
    %cst_21 = arith.constant 2.000000e+00 : f32
    %46 = vector.broadcast %cst_21 : f32 to vector<128x128xf32>
    %47 = arith.mulf %46, %32 : vector<128x128xf32>
    %48 = arith.addf %45, %47 : vector<128x128xf32>
    %49 = arith.addf %48, %42 : vector<128x128xf32>
    %cst_22 = arith.constant 0.166666672 : f32
    %50 = vector.broadcast %cst_22 : f32 to vector<128x128xf32>
    %51 = arith.mulf %49, %50 : vector<128x128xf32>
    %cst_23 = arith.constant 5.000000e-02 : f32
    %52 = vector.broadcast %cst_23 : f32 to vector<128x128xf32>
    %53 = arith.mulf %52, %51 : vector<128x128xf32>
    %54 = arith.addf %4, %53 : vector<128x128xf32>
    %cst_24 = arith.constant dense<0.000000e+00> : vector<128x128xf32>
    %55 = tpu.matmul %5, %0, %cst_24 {dimension_numbers = #tpu.dot_dimension_numbers<[1], [0], [0], [1], [0, 0, 1, 1], [], []>} : vector<128x128xf32>, vector<128x128xf32>, vector<128x128xf32> -> vector<128x128xf32>
    %56 = vector.broadcast %2 : vector<1x128xf32> to vector<128x128xf32>
    %57 = arith.addf %55, %56 : vector<128x128xf32>
    %58 = math.tanh %57 : vector<128x128xf32>
    %cst_25 = arith.constant dense<0.000000e+00> : vector<128x128xf32>
    %59 = tpu.matmul %58, %1, %cst_25 {dimension_numbers = #tpu.dot_dimension_numbers<[1], [0], [0], [1], [0, 0, 1, 1], [], []>} : vector<128x128xf32>, vector<128x128xf32>, vector<128x128xf32> -> vector<128x128xf32>
    %60 = vector.broadcast %3 : vector<1x128xf32> to vector<128x128xf32>
    %61 = arith.addf %59, %60 : vector<128x128xf32>
    %cst_26 = arith.constant 5.000000e-02 : f32
    %62 = vector.broadcast %cst_26 : f32 to vector<128x128xf32>
    %63 = arith.mulf %62, %61 : vector<128x128xf32>
    %64 = arith.addf %5, %63 : vector<128x128xf32>
    %cst_27 = arith.constant dense<0.000000e+00> : vector<128x128xf32>
    %65 = tpu.matmul %64, %0, %cst_27 {dimension_numbers = #tpu.dot_dimension_numbers<[1], [0], [0], [1], [0, 0, 1, 1], [], []>} : vector<128x128xf32>, vector<128x128xf32>, vector<128x128xf32> -> vector<128x128xf32>
    %66 = vector.broadcast %2 : vector<1x128xf32> to vector<128x128xf32>
    %67 = arith.addf %65, %66 : vector<128x128xf32>
    %68 = math.tanh %67 : vector<128x128xf32>
    %cst_28 = arith.constant dense<0.000000e+00> : vector<128x128xf32>
    %69 = tpu.matmul %68, %1, %cst_28 {dimension_numbers = #tpu.dot_dimension_numbers<[1], [0], [0], [1], [0, 0, 1, 1], [], []>} : vector<128x128xf32>, vector<128x128xf32>, vector<128x128xf32> -> vector<128x128xf32>
    %70 = vector.broadcast %3 : vector<1x128xf32> to vector<128x128xf32>
    %71 = arith.addf %69, %70 : vector<128x128xf32>
    %cst_29 = arith.constant 2.500000e-02 : f32
    %72 = vector.broadcast %cst_29 : f32 to vector<128x128xf32>
    %73 = arith.mulf %72, %71 : vector<128x128xf32>
    %74 = arith.addf %5, %73 : vector<128x128xf32>
    %cst_30 = arith.constant dense<0.000000e+00> : vector<128x128xf32>
    %75 = tpu.matmul %74, %0, %cst_30 {dimension_numbers = #tpu.dot_dimension_numbers<[1], [0], [0], [1], [0, 0, 1, 1], [], []>} : vector<128x128xf32>, vector<128x128xf32>, vector<128x128xf32> -> vector<128x128xf32>
    %76 = vector.broadcast %2 : vector<1x128xf32> to vector<128x128xf32>
    %77 = arith.addf %75, %76 : vector<128x128xf32>
    %78 = math.tanh %77 : vector<128x128xf32>
    %cst_31 = arith.constant dense<0.000000e+00> : vector<128x128xf32>
    %79 = tpu.matmul %78, %1, %cst_31 {dimension_numbers = #tpu.dot_dimension_numbers<[1], [0], [0], [1], [0, 0, 1, 1], [], []>} : vector<128x128xf32>, vector<128x128xf32>, vector<128x128xf32> -> vector<128x128xf32>
    %80 = vector.broadcast %3 : vector<1x128xf32> to vector<128x128xf32>
    %81 = arith.addf %79, %80 : vector<128x128xf32>
    %cst_32 = arith.constant 2.500000e-02 : f32
    %82 = vector.broadcast %cst_32 : f32 to vector<128x128xf32>
    %83 = arith.mulf %82, %81 : vector<128x128xf32>
    %84 = arith.addf %5, %83 : vector<128x128xf32>
    %cst_33 = arith.constant dense<0.000000e+00> : vector<128x128xf32>
    %85 = tpu.matmul %84, %0, %cst_33 {dimension_numbers = #tpu.dot_dimension_numbers<[1], [0], [0], [1], [0, 0, 1, 1], [], []>} : vector<128x128xf32>, vector<128x128xf32>, vector<128x128xf32> -> vector<128x128xf32>
    %86 = vector.broadcast %2 : vector<1x128xf32> to vector<128x128xf32>
    %87 = arith.addf %85, %86 : vector<128x128xf32>
    %88 = math.tanh %87 : vector<128x128xf32>
    %cst_34 = arith.constant dense<0.000000e+00> : vector<128x128xf32>
    %89 = tpu.matmul %88, %1, %cst_34 {dimension_numbers = #tpu.dot_dimension_numbers<[1], [0], [0], [1], [0, 0, 1, 1], [], []>} : vector<128x128xf32>, vector<128x128xf32>, vector<128x128xf32> -> vector<128x128xf32>
    %90 = vector.broadcast %3 : vector<1x128xf32> to vector<128x128xf32>
    %91 = arith.addf %89, %90 : vector<128x128xf32>
    %cst_35 = arith.constant 2.000000e+00 : f32
    %92 = vector.broadcast %cst_35 : f32 to vector<128x128xf32>
    %93 = arith.mulf %92, %71 : vector<128x128xf32>
    %94 = arith.addf %61, %93 : vector<128x128xf32>
    %cst_36 = arith.constant 2.000000e+00 : f32
    %95 = vector.broadcast %cst_36 : f32 to vector<128x128xf32>
    %96 = arith.mulf %95, %81 : vector<128x128xf32>
    %97 = arith.addf %94, %96 : vector<128x128xf32>
    %98 = arith.addf %97, %91 : vector<128x128xf32>
    %cst_37 = arith.constant 0.166666672 : f32
    %99 = vector.broadcast %cst_37 : f32 to vector<128x128xf32>
    %100 = arith.mulf %98, %99 : vector<128x128xf32>
    %cst_38 = arith.constant 5.000000e-02 : f32
    %101 = vector.broadcast %cst_38 : f32 to vector<128x128xf32>
    %102 = arith.mulf %101, %100 : vector<128x128xf32>
    %103 = arith.addf %5, %102 : vector<128x128xf32>
    %c0_39 = arith.constant 0 : index
    %c0_40 = arith.constant 0 : index
    %104 = vector.load %arg6[%c0_39, %c0_40] : memref<256x128xf32, #tpu.memory_space<vmem>>, vector<128x128xf32>
    tpu.vector_store %arg6[%c0_39, %c0_40], %54 {strides = array<i32>} : memref<256x128xf32, #tpu.memory_space<vmem>>, vector<128x128xf32>,
    %c128_41 = arith.constant 128 : index
    %c0_42 = arith.constant 0 : index
    %105 = vector.load %arg6[%c128_41, %c0_42] : memref<256x128xf32, #tpu.memory_space<vmem>>, vector<128x128xf32>
    tpu.vector_store %arg6[%c128_41, %c0_42], %103 {strides = array<i32>} : memref<256x128xf32, #tpu.memory_space<vmem>>, vector<128x128xf32>,
    return
  }
  func.func @transform_0(%arg0: i32) -> (i32, i32) {
    %c0_i32 = arith.constant 0 : i32
    %c0_i32_0 = arith.constant 0 : i32
    return %arg0, %c0_i32 : i32, i32
  }
  func.func @transform_1(%arg0: i32) -> (i32, i32) {
    %c0_i32 = arith.constant 0 : i32
    %c0_i32_0 = arith.constant 0 : i32
    %c0_i32_1 = arith.constant 0 : i32
    return %c0_i32, %c0_i32_0 : i32, i32
  }
  func.func @transform_2(%arg0: i32) -> (i32, i32) {
    %c0_i32 = arith.constant 0 : i32
    %c0_i32_0 = arith.constant 0 : i32
    %c0_i32_1 = arith.constant 0 : i32
    return %c0_i32, %c0_i32_0 : i32, i32
  }
  func.func @transform_3(%arg0: i32) -> (i32, i32) {
    %c0_i32 = arith.constant 0 : i32
    %c0_i32_0 = arith.constant 0 : i32
    %c0_i32_1 = arith.constant 0 : i32
    return %c0_i32, %c0_i32_0 : i32, i32
  }
  func.func @transform_4(%arg0: i32) -> (i32, i32) {
    %c0_i32 = arith.constant 0 : i32
    %c0_i32_0 = arith.constant 0 : i32
    %c0_i32_1 = arith.constant 0 : i32
    return %c0_i32, %c0_i32_0 : i32, i32
  }
  func.func @transform_5(%arg0: i32) -> (i32, i32) {
    %c0_i32 = arith.constant 0 : i32
    %c0_i32_0 = arith.constant 0 : i32
    return %arg0, %c0_i32 : i32, i32
  }
}

</mosaic_0001>

<bundles_post_ra>
// kernel: rk4_step.1
= control target key start
LH: loop header
LB: loop body
LE: loop exit
PB: predicated region body
PF: predicated region fallthrough
CT: control target
= control target key end

     0   :  { %10 = vsyncpa [#allocation3], 0  ;;  %s3610_s0 = inlined_call_operand.hbm [shape: f32[256,128], index: 0, kind: input, shape index: {}, may-alias: {0,5}]   ;;  %s3611_s1 = inlined_call_operand.vmem [shape: f32[128,128], index: 1, kind: input, shape index: {}]   ;;  %s3612_s2 = inlined_call_operand.vmem [shape: f32[1,128], index: 2, kind: input, shape index: {}]   ;;  %s3613_s3 = inlined_call_operand.vmem [shape: f32[128,128], index: 3, kind: input, shape index: {}]   ;;  %s3614_s4 = inlined_call_operand.vmem [shape: f32[1,128], index: 4, kind: input, shape index: {}]   ;;  %s3615_s5 = inlined_call_operand.hbm [shape: f32[256,128], index: 5, kind: output, shape index: {}, may-alias: {0,5}]  }
   0x1   :  { %11 = vsyncpa [#allocation4], 0  ;;  %s16_s20 = sshll.u32 %s3610_s0, 4  ;;  %s2158_s21 = smov [#allocation2]   ;;  %s17_s20 = int_to_ptr.hbm [resolvable:$true] %s16_s20 }
   0x2   :  { %s18_s22 = sshll.u32 %s2158_s21, 4  ;;  %s2159_s23 = smov 128   ;;  %s19_s22 = int_to_ptr.vmem [resolvable:$true] %s18_s22 }
   0x3   :  { %s2160_s24 = smov 8  }
   0x4   :  { %24 = dma.hbm_to_vmem [thread:$0]  %s17_s20, 4096, %s19_s22, [#allocation3], %s2159_s23, %s2159_s23, %s2160_s24  }
   0x5   :  { %2154 = dma.done.wait [#allocation3], 4096  }
   0x6   :  { %2155 = vsyncadd [#allocation3], 4294963200  ;;  %v2201_v0 = vld [vmem:[%s3611_s1 + $0x78] sm:$0xff]  ;;  %v2206_v1 = vld [vmem:[%s3611_s1 + $0x70] sm:$0xff]  ;;  %s1763_s18 = sshll.u32 %s3615_s5, 4  ;;  %s1764_s18 = int_to_ptr.hbm [resolvable:$true] %s1763_s18 }
   0x7   :  { %106 = vmatpush.msra.mxu0 %v2201_v0  ;;  %287 = vmatpush.msra.mxu2 %v2201_v0  ;;  %v2213_v2 = vld [vmem:[%s3611_s1 + $0x68] sm:$0xff]  ;;  %v2220_v3 = vld [vmem:[%s3611_s1 + $0x60] sm:$0xff]  ;;  %v2227_v4 = vld [vmem:[%s3611_s1 + $0x58] sm:$0xff] }
   0x8   :  { %v2234_v5 = vld [vmem:[%s3611_s1 + $0x50] sm:$0xff]  ;;  %v2241_v6 = vld [vmem:[%s3611_s1 + $0x48] sm:$0xff]  ;;  %v2248_v7 = vld [vmem:[%s3611_s1 + $0x40] sm:$0xff] }
   0x9   :  { %107 = vmatpush.msra.mxu0 %v2206_v1  ;;  %288 = vmatpush.msra.mxu2 %v2206_v1  ;;  %v2255_v8 = vld [vmem:[%s3611_s1 + $0x38] sm:$0xff]  ;;  %v2262_v9 = vld [vmem:[%s3611_s1 + $0x30] sm:$0xff]  ;;  %v2269_v10 = vld [vmem:[%s3611_s1 + $0x28] sm:$0xff] }
   0xa   :  { %v2276_v11 = vld [vmem:[%s3611_s1 + $0x20] sm:$0xff]  ;;  %v2283_v12 = vld [vmem:[%s3611_s1 + $0x18] sm:$0xff]  ;;  %v2290_v13 = vld [vmem:[%s3611_s1 + $0x10] sm:$0xff] }
   0xb   :  { %108 = vmatpush.msra.mxu0 %v2213_v2  ;;  %289 = vmatpush.msra.mxu2 %v2213_v2  ;;  %v2297_v14 = vld [vmem:[%s3611_s1 + $0x8] sm:$0xff]  ;;  %v2304_v15 = vld [vmem:[%s3611_s1] sm:$0xff]  ;;  %v2329_v18 = vld [vmem:[#allocation2 + $0x10] sm:$0xff] }
   0xc   :  { %v2307_v16 = vld [vmem:[#allocation2] sm:$0xff]  ;;  %v2318_v17 = vld [vmem:[#allocation2 + $0x8] sm:$0xff]  ;;  %v2340_v19 = vld [vmem:[#allocation2 + $0x18] sm:$0xff] }
   0xd   :  { %109 = vmatpush.msra.mxu0 %v2220_v3  ;;  %290 = vmatpush.msra.mxu2 %v2220_v3  ;;  %v2351_v20 = vld [vmem:[#allocation2 + $0x20] sm:$0xff]  ;;  %v2359_v21 = vld [vmem:[#allocation2 + $0x28] sm:$0xff]  ;;  %v2366_v22 = vld [vmem:[#allocation2 + $0x30] sm:$0xff] }
   0xe   :  { %v2373_v23 = vld [vmem:[#allocation2 + $0x38] sm:$0xff]  ;;  %v2380_v24 = vld [vmem:[#allocation2 + $0x40] sm:$0xff]  ;;  %v2385_v25 = vld [vmem:[#allocation2 + $0x48] sm:$0xff] }
   0xf   :  { %110 = vmatpush.msra.mxu0 %v2227_v4  ;;  %291 = vmatpush.msra.mxu2 %v2227_v4  ;;  %v2390_v26 = vld [vmem:[%s3613_s3 + $0x78] sm:$0xff]  ;;  %v2397_v27 = vld [vmem:[%s3613_s3 + $0x70] sm:$0xff]  ;;  %v2402_v28 = vld [vmem:[%s3613_s3 + $0x68] sm:$0xff] }
  0x10   :  { %190 = vmatpush.msra.mxu1 %v2390_v26  ;;  %368 = vmatpush.msra.mxu3 %v2390_v26  ;;  %v2409_v29 = vld [vmem:[%s3613_s3 + $0x60] sm:$0xff]  ;;  %v2413_v30 = vld [vmem:[#allocation2 + $0x50] sm:$0xff]  ;;  %v2420_v31 = vld [vmem:[%s3613_s3 + $0x58] sm:$0xff] }
  0x11   :  { %111 = vmatpush.msra.mxu0 %v2234_v5  ;;  %292 = vmatpush.msra.mxu2 %v2234_v5  ;;  %v2428_v32 = vld [vmem:[%s3613_s3 + $0x50] sm:$0xff]  ;;  %v2433_v33 = vld [vmem:[%s3613_s3 + $0x48] sm:$0xff]  ;;  %v2440_v34 = vld [vmem:[%s3613_s3 + $0x40] sm:$0xff] }
  0x12   :  { %191 = vmatpush.msra.mxu1 %v2397_v27  ;;  %369 = vmatpush.msra.mxu3 %v2397_v27  ;;  %v2444_v35 = vld [vmem:[#allocation2 + $0x58] sm:$0xff]  ;;  %v2459_v37 = vld [vmem:[%s3613_s3 + $0x30] sm:$0xff]  ;;  %v2464_v38 = vld [vmem:[%s3613_s3 + $0x28] sm:$0xff] }
  0x13   :  { %112 = vmatpush.msra.mxu0 %v2241_v6  ;;  %293 = vmatpush.msra.mxu2 %v2241_v6  ;;  %v2451_v36 = vld [vmem:[%s3613_s3 + $0x38] sm:$0xff]  ;;  %v2470_v39 = vld [vmem:[#allocation2 + $0x60] sm:$0xff]  ;;  %v2490_v42 = vld [vmem:[%s3613_s3 + $0x10] sm:$0xff] }
  0x14   :  { %192 = vmatpush.msra.mxu1 %v2402_v28  ;;  %370 = vmatpush.msra.mxu3 %v2402_v28  ;;  %v2475_v40 = vld [vmem:[%s3613_s3 + $0x20] sm:$0xff]  ;;  %v2482_v41 = vld [vmem:[%s3613_s3 + $0x18] sm:$0xff]  ;;  %v2495_v43 = vld [vmem:[%s3613_s3 + $0x8] sm:$0xff] }
  0x15   :  { %113 = vmatpush.msra.mxu0 %v2248_v7  ;;  %294 = vmatpush.msra.mxu2 %v2248_v7  ;;  %v2501_v44 = vld [vmem:[#allocation2 + $0x68] sm:$0xff]  ;;  %v2506_v45 = vld [vmem:[%s3613_s3] sm:$0xff]  ;;  %v2518_v46 = vld [vmem:[#allocation2 + $0x70] sm:$0xff] }
  0x16   :  { %193 = vmatpush.msra.mxu1 %v2409_v29  ;;  %371 = vmatpush.msra.mxu3 %v2409_v29  ;;  %v2529_v47 = vld [vmem:[#allocation2 + $0x78] sm:$0xff]  ;;  %v2540_v48 = vld [vmem:[%s3612_s2] ss:$0 sm:$0xff] }
  0x17   :  { %114 = vmatpush.msra.mxu0 %v2255_v8  ;;  %295 = vmatpush.msra.mxu2 %v2255_v8 }
  0x18   :  { %194 = vmatpush.msra.mxu1 %v2420_v31  ;;  %372 = vmatpush.msra.mxu3 %v2420_v31 }
  0x19   :  { %115 = vmatpush.msra.mxu0 %v2262_v9  ;;  %296 = vmatpush.msra.mxu2 %v2262_v9 }
  0x1a   :  { %195 = vmatpush.msra.mxu1 %v2428_v32  ;;  %373 = vmatpush.msra.mxu3 %v2428_v32 }
  0x1b   :  { %116 = vmatpush.msra.mxu0 %v2269_v10  ;;  %297 = vmatpush.msra.mxu2 %v2269_v10 }
  0x1c   :  { %196 = vmatpush.msra.mxu1 %v2433_v33  ;;  %374 = vmatpush.msra.mxu3 %v2433_v33 }
  0x1d   :  { %117 = vmatpush.msra.mxu0 %v2276_v11  ;;  %298 = vmatpush.msra.mxu2 %v2276_v11 }
  0x1e   :  { %197 = vmatpush.msra.mxu1 %v2440_v34  ;;  %375 = vmatpush.msra.mxu3 %v2440_v34 }
  0x1f   :  { %118 = vmatpush.msra.mxu0 %v2283_v12  ;;  %299 = vmatpush.msra.mxu2 %v2283_v12 }
  0x20   :  { %198 = vmatpush.msra.mxu1 %v2451_v36  ;;  %376 = vmatpush.msra.mxu3 %v2451_v36 }
  0x21   :  { %119 = vmatpush.msra.mxu0 %v2290_v13  ;;  %300 = vmatpush.msra.mxu2 %v2290_v13 }
  0x22   :  { %199 = vmatpush.msra.mxu1 %v2459_v37  ;;  %377 = vmatpush.msra.mxu3 %v2459_v37 }
  0x23   :  { %120 = vmatpush.msra.mxu0 %v2297_v14  ;;  %301 = vmatpush.msra.mxu2 %v2297_v14 }
  0x24   :  { %200 = vmatpush.msra.mxu1 %v2464_v38  ;;  %378 = vmatpush.msra.mxu3 %v2464_v38 }
  0x25   :  { %121 = vmatpush.msra.mxu0 %v2304_v15  ;;  %302 = vmatpush.msra.mxu2 %v2304_v15 }
  0x26   :  { %122 = vmatmul.f32.vlgmr.msra.gmra.mxu0 %v2307_v16  ;;  %201 = vmatpush.msra.mxu1 %v2475_v40 }
  0x27   :  { %643 = vmatpush.msrb.mxu2 %v2201_v0  ;;  %465 = vmatpush.msrb.mxu0 %v2201_v0 }
  0x28   :  { %379 = vmatpush.msra.mxu3 %v2475_v40  ;;  %202 = vmatpush.msra.mxu1 %v2482_v41 }
  0x29   :  { %644 = vmatpush.msrb.mxu2 %v2206_v1  ;;  %466 = vmatpush.msrb.mxu0 %v2206_v1 }
  0x2a   :  { %380 = vmatpush.msra.mxu3 %v2482_v41  ;;  %203 = vmatpush.msra.mxu1 %v2490_v42 }
  0x2b   :  { %645 = vmatpush.msrb.mxu2 %v2213_v2  ;;  %467 = vmatpush.msrb.mxu0 %v2213_v2 }
  0x2c   :  { %381 = vmatpush.msra.mxu3 %v2490_v42  ;;  %204 = vmatpush.msra.mxu1 %v2495_v43 }
  0x2d   :  { %646 = vmatpush.msrb.mxu2 %v2220_v3  ;;  %468 = vmatpush.msrb.mxu0 %v2220_v3 }
  0x2e   :  { %125 = vmatmul.f32.gmra.mxu0 %v2318_v17  ;;  %382 = vmatpush.msra.mxu3 %v2495_v43 }
  0x2f   :  { %647 = vmatpush.msrb.mxu2 %v2227_v4  ;;  %469 = vmatpush.msrb.mxu0 %v2227_v4 }
  0x30   :  { %205 = vmatpush.msra.mxu1 %v2506_v45  ;;  %383 = vmatpush.msra.mxu3 %v2506_v45 }
  0x31   :  { %648 = vmatpush.msrb.mxu2 %v2234_v5  ;;  %470 = vmatpush.msrb.mxu0 %v2234_v5 }
  0x32   :  { %546 = vmatpush.msrb.mxu1 %v2390_v26  ;;  %724 = vmatpush.msrb.mxu3 %v2390_v26 }
  0x33   :  { %649 = vmatpush.msrb.mxu2 %v2241_v6  ;;  %471 = vmatpush.msrb.mxu0 %v2241_v6 }
  0x34   :  { %547 = vmatpush.msrb.mxu1 %v2397_v27  ;;  %725 = vmatpush.msrb.mxu3 %v2397_v27 }
  0x35   :  { %650 = vmatpush.msrb.mxu2 %v2248_v7  ;;  %472 = vmatpush.msrb.mxu0 %v2248_v7 }
  0x36   :  { %128 = vmatmul.f32.gmra.mxu0 %v2329_v18  ;;  %548 = vmatpush.msrb.mxu1 %v2402_v28 }
  0x37   :  { %651 = vmatpush.msrb.mxu2 %v2255_v8  ;;  %473 = vmatpush.msrb.mxu0 %v2255_v8 }
  0x38   :  { %726 = vmatpush.msrb.mxu3 %v2402_v28  ;;  %549 = vmatpush.msrb.mxu1 %v2409_v29 }
  0x39   :  { %652 = vmatpush.msrb.mxu2 %v2262_v9  ;;  %474 = vmatpush.msrb.mxu0 %v2262_v9 }
  0x3a   :  { %727 = vmatpush.msrb.mxu3 %v2409_v29  ;;  %550 = vmatpush.msrb.mxu1 %v2420_v31 }
  0x3b   :  { %653 = vmatpush.msrb.mxu2 %v2269_v10  ;;  %475 = vmatpush.msrb.mxu0 %v2269_v10 }
  0x3c   :  { %728 = vmatpush.msrb.mxu3 %v2420_v31  ;;  %551 = vmatpush.msrb.mxu1 %v2428_v32 }
  0x3d   :  { %654 = vmatpush.msrb.mxu2 %v2276_v11  ;;  %476 = vmatpush.msrb.mxu0 %v2276_v11 }
  0x3e   :  { %131 = vmatmul.f32.gmra.mxu0 %v2340_v19  ;;  %729 = vmatpush.msrb.mxu3 %v2428_v32 }
  0x3f   :  { %655 = vmatpush.msrb.mxu2 %v2283_v12  ;;  %477 = vmatpush.msrb.mxu0 %v2283_v12 }
  0x40   :  { %552 = vmatpush.msrb.mxu1 %v2433_v33  ;;  %730 = vmatpush.msrb.mxu3 %v2433_v33 }
  0x41   :  { %656 = vmatpush.msrb.mxu2 %v2290_v13  ;;  %478 = vmatpush.msrb.mxu0 %v2290_v13 }
  0x42   :  { %553 = vmatpush.msrb.mxu1 %v2440_v34  ;;  %731 = vmatpush.msrb.mxu3 %v2440_v34 }
  0x43   :  { %657 = vmatpush.msrb.mxu2 %v2297_v14  ;;  %479 = vmatpush.msrb.mxu0 %v2297_v14 }
  0x44   :  { %554 = vmatpush.msrb.mxu1 %v2451_v36  ;;  %732 = vmatpush.msrb.mxu3 %v2451_v36 }
  0x45   :  { %658 = vmatpush.msrb.mxu2 %v2304_v15  ;;  %480 = vmatpush.msrb.mxu0 %v2304_v15 }
  0x46   :  { %134 = vmatmul.f32.gmra.mxu0 %v2351_v20  ;;  %555 = vmatpush.msrb.mxu1 %v2459_v37 }
  0x47   :  { %917 = vmatpush.msra.mxu0 %v2201_v0  ;;  %733 = vmatpush.msrb.mxu3 %v2459_v37 }
  0x48   :  { %556 = vmatpush.msrb.mxu1 %v2464_v38 }
  0x49   :  { %918 = vmatpush.msra.mxu0 %v2206_v1  ;;  %734 = vmatpush.msrb.mxu3 %v2464_v38 }
  0x4a   :  { %557 = vmatpush.msrb.mxu1 %v2475_v40 }
  0x4b   :  { %919 = vmatpush.msra.mxu0 %v2213_v2  ;;  %735 = vmatpush.msrb.mxu3 %v2475_v40 }
  0x4c   :  { %558 = vmatpush.msrb.mxu1 %v2482_v41 }
  0x4d   :  { %920 = vmatpush.msra.mxu0 %v2220_v3  ;;  %736 = vmatpush.msrb.mxu3 %v2482_v41 }
  0x4e   :  { %137 = vmatmul.f32.gmra.mxu0 %v2359_v21  ;;  %559 = vmatpush.msrb.mxu1 %v2490_v42 }
  0x4f   :  { %921 = vmatpush.msra.mxu0 %v2227_v4  ;;  %737 = vmatpush.msrb.mxu3 %v2490_v42 }
  0x50   :  { %560 = vmatpush.msrb.mxu1 %v2495_v43 }
  0x51   :  { %922 = vmatpush.msra.mxu0 %v2234_v5  ;;  %738 = vmatpush.msrb.mxu3 %v2495_v43 }
  0x52   :  { %561 = vmatpush.msrb.mxu1 %v2506_v45 }
  0x53   :  { %923 = vmatpush.msra.mxu0 %v2241_v6  ;;  %739 = vmatpush.msrb.mxu3 %v2506_v45 }
  0x55   :  { %924 = vmatpush.msra.mxu0 %v2248_v7 }
  0x56   :  { %140 = vmatmul.f32.gmra.mxu0 %v2366_v22 }
  0x57   :  { %925 = vmatpush.msra.mxu0 %v2255_v8 }
  0x59   :  { %926 = vmatpush.msra.mxu0 %v2262_v9 }
  0x5b   :  { %927 = vmatpush.msra.mxu0 %v2269_v10 }
  0x5d   :  { %928 = vmatpush.msra.mxu0 %v2276_v11 }
  0x5e   :  { %143 = vmatmul.f32.gmra.mxu0 %v2373_v23 }
  0x5f   :  { %929 = vmatpush.msra.mxu0 %v2283_v12 }
  0x61   :  { %930 = vmatpush.msra.mxu0 %v2290_v13 }
  0x63   :  { %931 = vmatpush.msra.mxu0 %v2297_v14 }
  0x65   :  { %932 = vmatpush.msra.mxu0 %v2304_v15 }
  0x66   :  { %146 = vmatmul.f32.gmra.mxu0 %v2380_v24 }
  0x6e   :  { %149 = vmatmul.f32.gmra.mxu0 %v2385_v25 }
  0x76   :  { %152 = vmatmul.f32.gmra.mxu0 %v2413_v30 }
  0x7e   :  { %155 = vmatmul.f32.gmra.mxu0 %v2444_v35 }
  0x86   :  { %158 = vmatmul.f32.gmra.mxu0 %v2470_v39 }
  0x8e   :  { %161 = vmatmul.f32.gmra.mxu0 %v2501_v44 }
  0x96   :  { %164 = vmatmul.f32.gmra.mxu0 %v2518_v46 }
  0x9e   :  { %167 = vmatmul.f32.gmra.mxu0 %v2529_v47 }
  0xa3   :  { %v123_v49 = vpop.f32.mrf.mxu0 }
  0xa4   :  { %v124_v50 = vadd.f32 %v2540_v48, %v123_v49 }
  0xa6   :  { %1782 = vtanh.f32 %v124_v50 }
  0xab   :  { %v126_v51 = vpop.f32.mrf.mxu0 }
  0xac   :  { %v1783_v52 = vpop.eup %1782  ;;  %v127_v53 = vadd.f32 %v2540_v48, %v126_v51 }
  0xad   :  { %206 = vmatmul.f32.vlgmr.msra.gmra.mxu1 %v1783_v52 }
  0xae   :  { %1784 = vtanh.f32 %v127_v53  ;;  %998 = vmatpush.msra.mxu1 %v2390_v26 }
  0xb0   :  { %999 = vmatpush.msra.mxu1 %v2397_v27 }
  0xb2   :  { %1000 = vmatpush.msra.mxu1 %v2402_v28 }
  0xb3   :  { %v129_v54 = vpop.f32.mrf.mxu0 }
  0xb4   :  { %v1785_v55 = vpop.eup %1784  ;;  %v130_v56 = vadd.f32 %v2540_v48, %v129_v54  ;;  %1001 = vmatpush.msra.mxu1 %v2409_v29 }
  0xb5   :  { %209 = vmatmul.f32.gmra.mxu1 %v1785_v55 }
  0xb6   :  { %1786 = vtanh.f32 %v130_v56  ;;  %1002 = vmatpush.msra.mxu1 %v2420_v31 }
  0xb8   :  { %1003 = vmatpush.msra.mxu1 %v2428_v32 }
  0xba   :  { %1004 = vmatpush.msra.mxu1 %v2433_v33 }
  0xbb   :  { %v132_v57 = vpop.f32.mrf.mxu0 }
  0xbc   :  { %v1787_v58 = vpop.eup %1786  ;;  %v133_v59 = vadd.f32 %v2540_v48, %v132_v57  ;;  %1005 = vmatpush.msra.mxu1 %v2440_v34 }
  0xbd   :  { %212 = vmatmul.f32.gmra.mxu1 %v1787_v58 }
  0xbe   :  { %1788 = vtanh.f32 %v133_v59  ;;  %1006 = vmatpush.msra.mxu1 %v2451_v36 }
  0xc0   :  { %1007 = vmatpush.msra.mxu1 %v2459_v37 }
  0xc2   :  { %1008 = vmatpush.msra.mxu1 %v2464_v38 }
  0xc3   :  { %v135_v60 = vpop.f32.mrf.mxu0 }
  0xc4   :  { %v1789_v61 = vpop.eup %1788  ;;  %v136_v62 = vadd.f32 %v2540_v48, %v135_v60  ;;  %1009 = vmatpush.msra.mxu1 %v2475_v40 }
  0xc5   :  { %215 = vmatmul.f32.gmra.mxu1 %v1789_v61 }
  0xc6   :  { %1790 = vtanh.f32 %v136_v62  ;;  %1010 = vmatpush.msra.mxu1 %v2482_v41 }
  0xc8   :  { %1011 = vmatpush.msra.mxu1 %v2490_v42 }
  0xca   :  { %1012 = vmatpush.msra.mxu1 %v2495_v43 }
  0xcb   :  { %v138_v63 = vpop.f32.mrf.mxu0 }
  0xcc   :  { %v1791_v49 = vpop.eup %1790  ;;  %v139_v50 = vadd.f32 %v2540_v48, %v138_v63  ;;  %1013 = vmatpush.msra.mxu1 %v2506_v45 }
  0xcd   :  { %218 = vmatmul.f32.gmra.mxu1 %v1791_v49 }
  0xce   :  { %1792 = vtanh.f32 %v139_v50 }
  0xd3   :  { %v141_v51 = vpop.f32.mrf.mxu0 }
  0xd4   :  { %v1793_v52 = vpop.eup %1792  ;;  %v142_v53 = vadd.f32 %v2540_v48, %v141_v51 }
  0xd5   :  { %221 = vmatmul.f32.gmra.mxu1 %v1793_v52 }
  0xd6   :  { %1794 = vtanh.f32 %v142_v53 }
  0xdb   :  { %v144_v54 = vpop.f32.mrf.mxu0 }
  0xdc   :  { %v1795_v55 = vpop.eup %1794  ;;  %v145_v56 = vadd.f32 %v2540_v48, %v144_v54 }
  0xdd   :  { %224 = vmatmul.f32.gmra.mxu1 %v1795_v55 }
  0xde   :  { %1796 = vtanh.f32 %v145_v56 }
  0xe3   :  { %v147_v57 = vpop.f32.mrf.mxu0 }
  0xe4   :  { %v1797_v58 = vpop.eup %1796  ;;  %v148_v59 = vadd.f32 %v2540_v48, %v147_v57 }
  0xe5   :  { %227 = vmatmul.f32.gmra.mxu1 %v1797_v58 }
  0xe6   :  { %1798 = vtanh.f32 %v148_v59 }
  0xeb   :  { %v150_v60 = vpop.f32.mrf.mxu0 }
  0xec   :  { %v1799_v61 = vpop.eup %1798  ;;  %v151_v62 = vadd.f32 %v2540_v48, %v150_v60 }
  0xed   :  { %230 = vmatmul.f32.gmra.mxu1 %v1799_v61 }
  0xee   :  { %1800 = vtanh.f32 %v151_v62 }
  0xf3   :  { %v153_v63 = vpop.f32.mrf.mxu0 }
  0xf4   :  { %v1801_v49 = vpop.eup %1800  ;;  %v154_v50 = vadd.f32 %v2540_v48, %v153_v63 }
  0xf5   :  { %233 = vmatmul.f32.gmra.mxu1 %v1801_v49 }
  0xf6   :  { %1802 = vtanh.f32 %v154_v50 }
  0xfb   :  { %v156_v51 = vpop.f32.mrf.mxu0 }
  0xfc   :  { %v1803_v52 = vpop.eup %1802  ;;  %v157_v53 = vadd.f32 %v2540_v48, %v156_v51 }
  0xfd   :  { %236 = vmatmul.f32.gmra.mxu1 %v1803_v52  ;;  %v2590_v52 = vld [vmem:[%s3614_s4] ss:$0 sm:$0xff] }
  0xfe   :  { %1804 = vtanh.f32 %v157_v53 }
 0x103   :  { %v159_v54 = vpop.f32.mrf.mxu0 }
 0x104   :  { %v1805_v55 = vpop.eup %1804  ;;  %v160_v56 = vadd.f32 %v2540_v48, %v159_v54 }
 0x105   :  { %239 = vmatmul.f32.gmra.mxu1 %v1805_v55 }
 0x106   :  { %1806 = vtanh.f32 %v160_v56 }
 0x10b   :  { %v162_v57 = vpop.f32.mrf.mxu0 }
 0x10c   :  { %v1807_v58 = vpop.eup %1806  ;;  %v163_v59 = vadd.f32 %v2540_v48, %v162_v57 }
 0x10d   :  { %242 = vmatmul.f32.gmra.mxu1 %v1807_v58 }
 0x10e   :  { %1808 = vtanh.f32 %v163_v59 }
 0x113   :  { %v165_v60 = vpop.f32.mrf.mxu0 }
 0x114   :  { %v1809_v61 = vpop.eup %1808  ;;  %v166_v62 = vadd.f32 %v2540_v48, %v165_v60 }
 0x115   :  { %245 = vmatmul.f32.gmra.mxu1 %v1809_v61 }
 0x116   :  { %1810 = vtanh.f32 %v166_v62 }
 0x11b   :  { %v168_v63 = vpop.f32.mrf.mxu0 }
 0x11c   :  { %v1811_v49 = vpop.eup %1810  ;;  %v169_v50 = vadd.f32 %v2540_v48, %v168_v63 }
 0x11d   :  { %248 = vmatmul.f32.gmra.mxu1 %v1811_v49 }
 0x11e   :  { %1812 = vtanh.f32 %v169_v50 }
 0x124   :  { %v1813_v51 = vpop.eup %1812 }
 0x125   :  { %251 = vmatmul.f32.gmra.mxu1 %v1813_v51 }
 0x12a   :  { %v207_v53 = vpop.f32.mrf.mxu1 }
 0x12b   :  { %v2593_v54 = vadd.f32 %v2590_v52, %v207_v53 }
 0x12d   :  { %v255_v55 = vmul.f32 0.05, %v2593_v54 }
 0x12f   :  { %v271_v56 = vadd.f32 %v255_v55, %v2307_v16 }
 0x131   :  { %303 = vmatmul.f32.vlgmr.msra.gmra.mxu2 %v271_v56 }
 0x132   :  { %v210_v57 = vpop.f32.mrf.mxu1  ;;  %1095 = vmatpush.msra.mxu2 %v2201_v0 }
 0x133   :  { %v2599_v58 = vadd.f32 %v2590_v52, %v210_v57 }
 0x134   :  { %1096 = vmatpush.msra.mxu2 %v2206_v1 }
 0x135   :  { %v256_v59 = vmul.f32 0.05, %v2599_v58 }
 0x136   :  { %1097 = vmatpush.msra.mxu2 %v2213_v2 }
 0x137   :  { %v272_v60 = vadd.f32 %v256_v59, %v2318_v17 }
 0x138   :  { %1098 = vmatpush.msra.mxu2 %v2220_v3 }
 0x139   :  { %306 = vmatmul.f32.gmra.mxu2 %v272_v60 }
 0x13a   :  { %v213_v61 = vpop.f32.mrf.mxu1  ;;  %1099 = vmatpush.msra.mxu2 %v2227_v4 }
 0x13b   :  { %v2608_v62 = vadd.f32 %v2590_v52, %v213_v61 }
 0x13c   :  { %1100 = vmatpush.msra.mxu2 %v2234_v5 }
 0x13d   :  { %3630 = vst [vmem:[#allocation8_spill] sm:$0xff] %v2608_v62  ;;  %v257_v63 = vmul.f32 0.05, %v2608_v62 }
 0x13e   :  { %1101 = vmatpush.msra.mxu2 %v2241_v6 }
 0x13f   :  { %v273_v49 = vadd.f32 %v257_v63, %v2329_v18 }
 0x140   :  { %1102 = vmatpush.msra.mxu2 %v2248_v7 }
 0x141   :  { %309 = vmatmul.f32.gmra.mxu2 %v273_v49 }
 0x142   :  { %v216_v50 = vpop.f32.mrf.mxu1  ;;  %1103 = vmatpush.msra.mxu2 %v2255_v8 }
 0x143   :  { %v2617_v51 = vadd.f32 %v2590_v52, %v216_v50 }
 0x144   :  { %1104 = vmatpush.msra.mxu2 %v2262_v9 }
 0x145   :  { %3631 = vst [vmem:[#allocation9_spill] sm:$0xff] %v2617_v51  ;;  %v258_v53 = vmul.f32 0.05, %v2617_v51 }
 0x146   :  { %1105 = vmatpush.msra.mxu2 %v2269_v10 }
 0x147   :  { %v274_v55 = vadd.f32 %v258_v53, %v2340_v19 }
 0x148   :  { %1106 = vmatpush.msra.mxu2 %v2276_v11 }
 0x149   :  { %312 = vmatmul.f32.gmra.mxu2 %v274_v55 }
 0x14a   :  { %v219_v56 = vpop.f32.mrf.mxu1  ;;  %1107 = vmatpush.msra.mxu2 %v2283_v12 }
 0x14b   :  { %v2626_v57 = vadd.f32 %v2590_v52, %v219_v56 }
 0x14c   :  { %1108 = vmatpush.msra.mxu2 %v2290_v13 }
 0x14d   :  { %3632 = vst [vmem:[#allocation10_spill] sm:$0xff] %v2626_v57  ;;  %v259_v59 = vmul.f32 0.05, %v2626_v57 }
 0x14e   :  { %1109 = vmatpush.msra.mxu2 %v2297_v14 }
 0x14f   :  { %v275_v60 = vadd.f32 %v259_v59, %v2351_v20 }
 0x150   :  { %1110 = vmatpush.msra.mxu2 %v2304_v15 }
 0x151   :  { %315 = vmatmul.f32.gmra.mxu2 %v275_v60 }
 0x152   :  { %v222_v61 = vpop.f32.mrf.mxu1 }
 0x153   :  { %v2634_v63 = vadd.f32 %v2590_v52, %v222_v61 }
 0x155   :  { %3633 = vst [vmem:[#allocation11_spill] sm:$0xff] %v2634_v63  ;;  %v260_v49 = vmul.f32 0.05, %v2634_v63 }
 0x157   :  { %v276_v50 = vadd.f32 %v260_v49, %v2359_v21 }
 0x159   :  { %318 = vmatmul.f32.gmra.mxu2 %v276_v50 }
 0x15a   :  { %v225_v53 = vpop.f32.mrf.mxu1 }
 0x15b   :  { %v2639_v55 = vadd.f32 %v2590_v52, %v225_v53 }
 0x15d   :  { %3634 = vst [vmem:[#allocation12_spill] sm:$0xff] %v2639_v55  ;;  %v261_v56 = vmul.f32 0.05, %v2639_v55 }
 0x15f   :  { %v277_v59 = vadd.f32 %v261_v56, %v2366_v22 }
 0x161   :  { %321 = vmatmul.f32.gmra.mxu2 %v277_v59 }
 0x162   :  { %v228_v57 = vpop.f32.mrf.mxu1 }
 0x163   :  { %v2644_v60 = vadd.f32 %v2590_v52, %v228_v57 }
 0x165   :  { %3635 = vst [vmem:[#allocation13_spill] sm:$0xff] %v2644_v60  ;;  %v262_v61 = vmul.f32 0.05, %v2644_v60 }
 0x167   :  { %v278_v63 = vadd.f32 %v262_v61, %v2373_v23 }
 0x169   :  { %324 = vmatmul.f32.gmra.mxu2 %v278_v63 }
 0x16a   :  { %v231_v49 = vpop.f32.mrf.mxu1 }
 0x16b   :  { %v2649_v50 = vadd.f32 %v2590_v52, %v231_v49 }
 0x16d   :  { %3636 = vst [vmem:[#allocation14_spill] sm:$0xff] %v2649_v50  ;;  %v263_v53 = vmul.f32 0.05, %v2649_v50 }
 0x16f   :  { %v279_v55 = vadd.f32 %v263_v53, %v2380_v24 }
 0x171   :  { %327 = vmatmul.f32.gmra.mxu2 %v279_v55 }
 0x172   :  { %v234_v56 = vpop.f32.mrf.mxu1 }
 0x173   :  { %v2654_v59 = vadd.f32 %v2590_v52, %v234_v56 }
 0x175   :  { %3637 = vst [vmem:[#allocation15_spill] sm:$0xff] %v2654_v59  ;;  %v264_v57 = vmul.f32 0.05, %v2654_v59 }
 0x177   :  { %v280_v60 = vadd.f32 %v264_v57, %v2385_v25 }
 0x179   :  { %330 = vmatmul.f32.gmra.mxu2 %v280_v60 }
 0x17a   :  { %v237_v61 = vpop.f32.mrf.mxu1 }
 0x17b   :  { %v2659_v63 = vadd.f32 %v2590_v52, %v237_v61 }
 0x17d   :  { %3638 = vst [vmem:[#allocation16_spill] sm:$0xff] %v2659_v63  ;;  %v265_v49 = vmul.f32 0.05, %v2659_v63 }
 0x17f   :  { %v281_v50 = vadd.f32 %v265_v49, %v2413_v30 }
 0x181   :  { %333 = vmatmul.f32.gmra.mxu2 %v281_v50 }
 0x182   :  { %v240_v53 = vpop.f32.mrf.mxu1 }
 0x183   :  { %v2664_v55 = vadd.f32 %v2590_v52, %v240_v53 }
 0x185   :  { %3639 = vst [vmem:[#allocation17_spill] sm:$0xff] %v2664_v55  ;;  %v266_v56 = vmul.f32 0.05, %v2664_v55 }
 0x187   :  { %v282_v59 = vadd.f32 %v266_v56, %v2444_v35 }
 0x189   :  { %336 = vmatmul.f32.gmra.mxu2 %v282_v59 }
 0x18a   :  { %v243_v57 = vpop.f32.mrf.mxu1 }
 0x18b   :  { %v2669_v60 = vadd.f32 %v2590_v52, %v243_v57 }
 0x18d   :  { %3640 = vst [vmem:[#allocation18_spill] sm:$0xff] %v2669_v60  ;;  %v267_v61 = vmul.f32 0.05, %v2669_v60 }
 0x18f   :  { %v283_v63 = vadd.f32 %v267_v61, %v2470_v39 }
 0x191   :  { %339 = vmatmul.f32.gmra.mxu2 %v283_v63 }
 0x192   :  { %v246_v49 = vpop.f32.mrf.mxu1 }
 0x193   :  { %v2674_v50 = vadd.f32 %v2590_v52, %v246_v49 }
 0x195   :  { %3641 = vst [vmem:[#allocation19_spill] sm:$0xff] %v2674_v50  ;;  %v268_v53 = vmul.f32 0.05, %v2674_v50 }
 0x197   :  { %v284_v55 = vadd.f32 %v268_v53, %v2501_v44 }
 0x199   :  { %342 = vmatmul.f32.gmra.mxu2 %v284_v55 }
 0x19a   :  { %v249_v56 = vpop.f32.mrf.mxu1 }
 0x19b   :  { %v2679_v59 = vadd.f32 %v2590_v52, %v249_v56 }
 0x19d   :  { %3642 = vst [vmem:[#allocation20_spill] sm:$0xff] %v2679_v59  ;;  %v269_v57 = vmul.f32 0.05, %v2679_v59 }
 0x19f   :  { %v285_v60 = vadd.f32 %v269_v57, %v2518_v46 }
 0x1a1   :  { %345 = vmatmul.f32.gmra.mxu2 %v285_v60 }
 0x1a2   :  { %v252_v61 = vpop.f32.mrf.mxu1 }
 0x1a3   :  { %v2684_v63 = vadd.f32 %v2590_v52, %v252_v61 }
 0x1a5   :  { %3643 = vst [vmem:[#allocation21_spill] sm:$0xff] %v2684_v63  ;;  %v270_v49 = vmul.f32 0.05, %v2684_v63 }
 0x1a7   :  { %v286_v50 = vadd.f32 %v270_v49, %v2529_v47 }
 0x1a9   :  { %348 = vmatmul.f32.gmra.mxu2 %v286_v50 }
 0x1b4   :  { %v304_v53 = vpop.f32.mrf.mxu2 }
 0x1b5   :  { %v305_v55 = vadd.f32 %v2540_v48, %v304_v53 }
 0x1b7   :  { %1814 = vtanh.f32 %v305_v55 }
 0x1bc   :  { %v307_v56 = vpop.f32.mrf.mxu2 }
 0x1bd   :  { %v1815_v51 = vpop.eup %1814  ;;  %v308_v59 = vadd.f32 %v2540_v48, %v307_v56 }
 0x1be   :  { %384 = vmatmul.f32.vlgmr.msra.gmra.mxu3 %v1815_v51 }
 0x1bf   :  { %1816 = vtanh.f32 %v308_v59  ;;  %1176 = vmatpush.msra.mxu3 %v2390_v26 }
 0x1c1   :  { %1177 = vmatpush.msra.mxu3 %v2397_v27 }
 0x1c3   :  { %1178 = vmatpush.msra.mxu3 %v2402_v28 }
 0x1c4   :  { %v310_v60 = vpop.f32.mrf.mxu2 }
 0x1c5   :  { %v1817_v57 = vpop.eup %1816  ;;  %v311_v50 = vadd.f32 %v2540_v48, %v310_v60  ;;  %1179 = vmatpush.msra.mxu3 %v2409_v29 }
 0x1c6   :  { %387 = vmatmul.f32.gmra.mxu3 %v1817_v57 }
 0x1c7   :  { %1818 = vtanh.f32 %v311_v50  ;;  %1180 = vmatpush.msra.mxu3 %v2420_v31 }
 0x1c9   :  { %1181 = vmatpush.msra.mxu3 %v2428_v32 }
 0x1cb   :  { %1182 = vmatpush.msra.mxu3 %v2433_v33 }
 0x1cc   :  { %v313_v51 = vpop.f32.mrf.mxu2 }
 0x1cd   :  { %v1819_v59 = vpop.eup %1818  ;;  %v314_v61 = vadd.f32 %v2540_v48, %v313_v51  ;;  %1183 = vmatpush.msra.mxu3 %v2440_v34 }
 0x1ce   :  { %390 = vmatmul.f32.gmra.mxu3 %v1819_v59 }
 0x1cf   :  { %1820 = vtanh.f32 %v314_v61  ;;  %1184 = vmatpush.msra.mxu3 %v2451_v36 }
 0x1d1   :  { %1185 = vmatpush.msra.mxu3 %v2459_v37 }
 0x1d3   :  { %1186 = vmatpush.msra.mxu3 %v2464_v38 }
 0x1d4   :  { %v316_v49 = vpop.f32.mrf.mxu2 }
 0x1d5   :  { %v1821_v53 = vpop.eup %1820  ;;  %v317_v55 = vadd.f32 %v2540_v48, %v316_v49  ;;  %1187 = vmatpush.msra.mxu3 %v2475_v40 }
 0x1d6   :  { %393 = vmatmul.f32.gmra.mxu3 %v1821_v53 }
 0x1d7   :  { %1822 = vtanh.f32 %v317_v55  ;;  %1188 = vmatpush.msra.mxu3 %v2482_v41 }
 0x1d9   :  { %1189 = vmatpush.msra.mxu3 %v2490_v42 }
 0x1db   :  { %1190 = vmatpush.msra.mxu3 %v2495_v43 }
 0x1dc   :  { %v319_v56 = vpop.f32.mrf.mxu2 }
 0x1dd   :  { %v1823_v60 = vpop.eup %1822  ;;  %v320_v57 = vadd.f32 %v2540_v48, %v319_v56  ;;  %1191 = vmatpush.msra.mxu3 %v2506_v45 }
 0x1de   :  { %396 = vmatmul.f32.gmra.mxu3 %v1823_v60 }
 0x1df   :  { %1824 = vtanh.f32 %v320_v57 }
 0x1e4   :  { %v322_v50 = vpop.f32.mrf.mxu2 }
 0x1e5   :  { %v1825_v51 = vpop.eup %1824  ;;  %v323_v59 = vadd.f32 %v2540_v48, %v322_v50 }
 0x1e6   :  { %399 = vmatmul.f32.gmra.mxu3 %v1825_v51 }
 0x1e7   :  { %1826 = vtanh.f32 %v323_v59 }
 0x1ec   :  { %v325_v61 = vpop.f32.mrf.mxu2 }
 0x1ed   :  { %v1827_v49 = vpop.eup %1826  ;;  %v326_v53 = vadd.f32 %v2540_v48, %v325_v61 }
 0x1ee   :  { %402 = vmatmul.f32.gmra.mxu3 %v1827_v49 }
 0x1ef   :  { %1828 = vtanh.f32 %v326_v53 }
 0x1f4   :  { %v328_v55 = vpop.f32.mrf.mxu2 }
 0x1f5   :  { %v1829_v63 = vpop.eup %1828  ;;  %v329_v56 = vadd.f32 %v2540_v48, %v328_v55 }
 0x1f6   :  { %405 = vmatmul.f32.gmra.mxu3 %v1829_v63 }
 0x1f7   :  { %1830 = vtanh.f32 %v329_v56 }
 0x1fc   :  { %v331_v60 = vpop.f32.mrf.mxu2 }
 0x1fd   :  { %v1831_v57 = vpop.eup %1830  ;;  %v332_v62 = vadd.f32 %v2540_v48, %v331_v60 }
 0x1fe   :  { %408 = vmatmul.f32.gmra.mxu3 %v1831_v57 }
 0x1ff   :  { %1832 = vtanh.f32 %v332_v62 }
 0x204   :  { %v334_v50 = vpop.f32.mrf.mxu2 }
 0x205   :  { %v1833_v51 = vpop.eup %1832  ;;  %v335_v59 = vadd.f32 %v2540_v48, %v334_v50 }
 0x206   :  { %411 = vmatmul.f32.gmra.mxu3 %v1833_v51 }
 0x207   :  { %1834 = vtanh.f32 %v335_v59 }
 0x20c   :  { %v337_v61 = vpop.f32.mrf.mxu2 }
 0x20d   :  { %v1835_v49 = vpop.eup %1834  ;;  %v338_v53 = vadd.f32 %v2540_v48, %v337_v61 }
 0x20e   :  { %414 = vmatmul.f32.gmra.mxu3 %v1835_v49 }
 0x20f   :  { %1836 = vtanh.f32 %v338_v53 }
 0x214   :  { %v340_v63 = vpop.f32.mrf.mxu2 }
 0x215   :  { %v1837_v55 = vpop.eup %1836  ;;  %v341_v56 = vadd.f32 %v2540_v48, %v340_v63 }
 0x216   :  { %417 = vmatmul.f32.gmra.mxu3 %v1837_v55 }
 0x217   :  { %1838 = vtanh.f32 %v341_v56 }
 0x21c   :  { %v343_v60 = vpop.f32.mrf.mxu2 }
 0x21d   :  { %v1839_v62 = vpop.eup %1838  ;;  %v344_v57 = vadd.f32 %v2540_v48, %v343_v60 }
 0x21e   :  { %420 = vmatmul.f32.gmra.mxu3 %v1839_v62 }
 0x21f   :  { %1840 = vtanh.f32 %v344_v57 }
 0x224   :  { %v346_v50 = vpop.f32.mrf.mxu2 }
 0x225   :  { %v1841_v51 = vpop.eup %1840  ;;  %v347_v59 = vadd.f32 %v2540_v48, %v346_v50 }
 0x226   :  { %423 = vmatmul.f32.gmra.mxu3 %v1841_v51 }
 0x227   :  { %1842 = vtanh.f32 %v347_v59 }
 0x22c   :  { %v349_v61 = vpop.f32.mrf.mxu2 }
 0x22d   :  { %v1843_v49 = vpop.eup %1842  ;;  %v350_v53 = vadd.f32 %v2540_v48, %v349_v61 }
 0x22e   :  { %426 = vmatmul.f32.gmra.mxu3 %v1843_v49 }
 0x22f   :  { %1844 = vtanh.f32 %v350_v53 }
 0x235   :  { %v1845_v63 = vpop.eup %1844 }
 0x236   :  { %429 = vmatmul.f32.gmra.mxu3 %v1845_v63 }
 0x241   :  { %v385_v55 = vpop.f32.mrf.mxu3 }
 0x242   :  { %v2721_v56 = vadd.f32 %v2590_v52, %v385_v55 }
 0x244   :  { %v433_v60 = vmul.f32 0.025, %v2721_v56 }
 0x246   :  { %v449_v62 = vadd.f32 %v433_v60, %v2307_v16 }
 0x248   :  { %481 = vmatmul.f32.vlgmr.msrb.gmra.mxu0 %v449_v62 }
 0x249   :  { %v388_v57 = vpop.f32.mrf.mxu3  ;;  %1273 = vmatpush.msrb.mxu0 %v2201_v0 }
 0x24a   :  { %v2727_v50 = vadd.f32 %v2590_v52, %v388_v57 }
 0x24b   :  { %1274 = vmatpush.msrb.mxu0 %v2206_v1 }
 0x24c   :  { %v434_v51 = vmul.f32 0.025, %v2727_v50 }
 0x24d   :  { %1275 = vmatpush.msrb.mxu0 %v2213_v2 }
 0x24e   :  { %v450_v59 = vadd.f32 %v434_v51, %v2318_v17 }
 0x24f   :  { %1276 = vmatpush.msrb.mxu0 %v2220_v3 }
 0x250   :  { %484 = vmatmul.f32.gmra.mxu0 %v450_v59 }
 0x251   :  { %v391_v61 = vpop.f32.mrf.mxu3  ;;  %1277 = vmatpush.msrb.mxu0 %v2227_v4 }
 0x252   :  { %v2736_v16 = vadd.f32 %v2590_v52, %v391_v61 }
 0x253   :  { %1278 = vmatpush.msrb.mxu0 %v2234_v5 }
 0x254   :  { %v435_v0 = vmul.f32 0.025, %v2736_v16 }
 0x255   :  { %1279 = vmatpush.msrb.mxu0 %v2241_v6 }
 0x256   :  { %v451_v1 = vadd.f32 %v435_v0, %v2329_v18 }
 0x257   :  { %1280 = vmatpush.msrb.mxu0 %v2248_v7 }
 0x258   :  { %487 = vmatmul.f32.gmra.mxu0 %v451_v1 }
 0x259   :  { %v394_v2 = vpop.f32.mrf.mxu3  ;;  %1281 = vmatpush.msrb.mxu0 %v2255_v8 }
 0x25a   :  { %v2745_v3 = vadd.f32 %v2590_v52, %v394_v2 }
 0x25b   :  { %1282 = vmatpush.msrb.mxu0 %v2262_v9 }
 0x25c   :  { %v436_v4 = vmul.f32 0.025, %v2745_v3 }
 0x25d   :  { %1283 = vmatpush.msrb.mxu0 %v2269_v10 }
 0x25e   :  { %v452_v5 = vadd.f32 %v436_v4, %v2340_v19 }
 0x25f   :  { %1284 = vmatpush.msrb.mxu0 %v2276_v11 }
 0x260   :  { %490 = vmatmul.f32.gmra.mxu0 %v452_v5 }
 0x261   :  { %v397_v6 = vpop.f32.mrf.mxu3  ;;  %1285 = vmatpush.msrb.mxu0 %v2283_v12 }
 0x262   :  { %v2754_v7 = vadd.f32 %v2590_v52, %v397_v6 }
 0x263   :  { %1286 = vmatpush.msrb.mxu0 %v2290_v13 }
 0x264   :  { %v437_v8 = vmul.f32 0.025, %v2754_v7 }
 0x265   :  { %1287 = vmatpush.msrb.mxu0 %v2297_v14 }
 0x266   :  { %v453_v9 = vadd.f32 %v437_v8, %v2351_v20 }
 0x267   :  { %1288 = vmatpush.msrb.mxu0 %v2304_v15 }
 0x268   :  { %493 = vmatmul.f32.gmra.mxu0 %v453_v9 }
 0x269   :  { %v400_v10 = vpop.f32.mrf.mxu3 }
 0x26a   :  { %v2762_v11 = vadd.f32 %v2590_v52, %v400_v10 }
 0x26c   :  { %v438_v12 = vmul.f32 0.025, %v2762_v11 }
 0x26e   :  { %v454_v17 = vadd.f32 %v438_v12, %v2359_v21 }
 0x270   :  { %496 = vmatmul.f32.gmra.mxu0 %v454_v17 }
 0x271   :  { %v403_v18 = vpop.f32.mrf.mxu3 }
 0x272   :  { %v2767_v13 = vadd.f32 %v2590_v52, %v403_v18 }
 0x274   :  { %v439_v14 = vmul.f32 0.025, %v2767_v13 }
 0x276   :  { %v455_v19 = vadd.f32 %v439_v14, %v2366_v22 }
 0x278   :  { %499 = vmatmul.f32.gmra.mxu0 %v455_v19 }
 0x279   :  { %v406_v15 = vpop.f32.mrf.mxu3 }
 0x27a   :  { %v2772_v20 = vadd.f32 %v2590_v52, %v406_v15 }
 0x27c   :  { %v440_v49 = vmul.f32 0.025, %v2772_v20 }
 0x27e   :  { %v456_v53 = vadd.f32 %v440_v49, %v2373_v23 }
 0x280   :  { %502 = vmatmul.f32.gmra.mxu0 %v456_v53  ;;  %v2816_v53 = vld [vmem:[#allocation2 + $0x80] sm:$0xff] }
 0x281   :  { %v409_v21 = vpop.f32.mrf.mxu3 }
 0x282   :  { %v2777_v63 = vadd.f32 %v2590_v52, %v409_v21 }
 0x284   :  { %v441_v55 = vmul.f32 0.025, %v2777_v63 }
 0x286   :  { %v457_v60 = vadd.f32 %v441_v55, %v2380_v24 }
 0x288   :  { %505 = vmatmul.f32.gmra.mxu0 %v457_v60 }
 0x289   :  { %v412_v22 = vpop.f32.mrf.mxu3 }
 0x28a   :  { %v2782_v62 = vadd.f32 %v2590_v52, %v412_v22 }
 0x28c   :  { %v442_v57 = vmul.f32 0.025, %v2782_v62 }
 0x28e   :  { %v458_v51 = vadd.f32 %v442_v57, %v2385_v25  ;;  %v2827_v57 = vld [vmem:[#allocation2 + $0x90] sm:$0xff] }
 0x290   :  { %508 = vmatmul.f32.gmra.mxu0 %v458_v51 }
 0x291   :  { %v415_v23 = vpop.f32.mrf.mxu3 }
 0x292   :  { %v2787_v59 = vadd.f32 %v2590_v52, %v415_v23 }
 0x294   :  { %v443_v61 = vmul.f32 0.025, %v2787_v59 }
 0x296   :  { %v459_v0 = vadd.f32 %v443_v61, %v2413_v30 }
 0x298   :  { %511 = vmatmul.f32.gmra.mxu0 %v459_v0  ;;  %v2856_v0 = vld [vmem:[#allocation2 + $0xb0] sm:$0xff] }
 0x299   :  { %v418_v24 = vpop.f32.mrf.mxu3 }
 0x29a   :  { %v2792_v1 = vadd.f32 %v2590_v52, %v418_v24  ;;  %v2860_v24 = vld [vmem:[#allocation2 + $0xb8] sm:$0xff] }
 0x29c   :  { %v444_v2 = vmul.f32 0.025, %v2792_v1 }
 0x29e   :  { %v460_v4 = vadd.f32 %v444_v2, %v2444_v35 }
 0x2a0   :  { %514 = vmatmul.f32.gmra.mxu0 %v460_v4 }
 0x2a1   :  { %v421_v25 = vpop.f32.mrf.mxu3 }
 0x2a2   :  { %v2797_v5 = vadd.f32 %v2590_v52, %v421_v25  ;;  %v2864_v25 = vld [vmem:[#allocation2 + $0xc0] sm:$0xff] }
 0x2a4   :  { %v445_v6 = vmul.f32 0.025, %v2797_v5 }
 0x2a6   :  { %v461_v8 = vadd.f32 %v445_v6, %v2470_v39 }
 0x2a8   :  { %517 = vmatmul.f32.gmra.mxu0 %v461_v8 }
 0x2a9   :  { %v424_v30 = vpop.f32.mrf.mxu3 }
 0x2aa   :  { %v2802_v9 = vadd.f32 %v2590_v52, %v424_v30 }
 0x2ac   :  { %v446_v10 = vmul.f32 0.025, %v2802_v9 }
 0x2ae   :  { %v462_v12 = vadd.f32 %v446_v10, %v2501_v44  ;;  %v2868_v10 = vld [vmem:[#allocation2 + $0xc8] sm:$0xff] }
 0x2b0   :  { %520 = vmatmul.f32.gmra.mxu0 %v462_v12 }
 0x2b1   :  { %v427_v35 = vpop.f32.mrf.mxu3 }
 0x2b2   :  { %v2807_v17 = vadd.f32 %v2590_v52, %v427_v35 }
 0x2b4   :  { %v447_v18 = vmul.f32 0.025, %v2807_v17 }
 0x2b6   :  { %v463_v14 = vadd.f32 %v447_v18, %v2518_v46  ;;  %v2820_v46 = vld [vmem:[#allocation2 + $0x88] sm:$0xff] }
 0x2b8   :  { %523 = vmatmul.f32.gmra.mxu0 %v463_v14  ;;  %v2872_v14 = vld [vmem:[#allocation2 + $0xd0] sm:$0xff] }
 0x2b9   :  { %v430_v39 = vpop.f32.mrf.mxu3 }
 0x2ba   :  { %v2812_v19 = vadd.f32 %v2590_v52, %v430_v39 }
 0x2bc   :  { %v448_v15 = vmul.f32 0.025, %v2812_v19 }
 0x2be   :  { %v464_v49 = vadd.f32 %v448_v15, %v2529_v47 }
 0x2c0   :  { %526 = vmatmul.f32.gmra.mxu0 %v464_v49 }
 0x2c5   :  { %v482_v44 = vpop.f32.mrf.mxu0 }
 0x2c6   :  { %v483_v21 = vadd.f32 %v2540_v48, %v482_v44  ;;  %v2876_v44 = vld [vmem:[#allocation2 + $0xd8] sm:$0xff] }
 0x2c8   :  { %1846 = vtanh.f32 %v483_v21  ;;  %933 = vmatmul.f32.vlgmr.msra.gmra.mxu0 %v2816_v53 }
 0x2cd   :  { %v485_v55 = vpop.f32.mrf.mxu0 }
 0x2ce   :  { %v1847_v60 = vpop.eup %1846  ;;  %v486_v22 = vadd.f32 %v2540_v48, %v485_v55 }
 0x2cf   :  { %562 = vmatmul.f32.vlgmr.msrb.gmra.mxu1 %v1847_v60 }
 0x2d0   :  { %1848 = vtanh.f32 %v486_v22  ;;  %936 = vmatmul.f32.gmra.mxu0 %v2820_v46  ;;  %1354 = vmatpush.msrb.mxu1 %v2390_v26  ;;  %v2880_v22 = vld [vmem:[#allocation2 + $0xe0] sm:$0xff] }
 0x2d2   :  { %1355 = vmatpush.msrb.mxu1 %v2397_v27  ;;  %v2835_v27 = vld [vmem:[#allocation2 + $0x98] sm:$0xff] }
 0x2d4   :  { %1356 = vmatpush.msrb.mxu1 %v2402_v28 }
 0x2d5   :  { %v488_v47 = vpop.f32.mrf.mxu0 }
 0x2d6   :  { %v1849_v51 = vpop.eup %1848  ;;  %v489_v23 = vadd.f32 %v2540_v48, %v488_v47  ;;  %1357 = vmatpush.msrb.mxu1 %v2409_v29 }
 0x2d7   :  { %565 = vmatmul.f32.gmra.mxu1 %v1849_v51 }
 0x2d8   :  { %1850 = vtanh.f32 %v489_v23  ;;  %939 = vmatmul.f32.gmra.mxu0 %v2827_v57  ;;  %1358 = vmatpush.msrb.mxu1 %v2420_v31  ;;  %v2843_v31 = vld [vmem:[#allocation2 + $0xa0] sm:$0xff] }
 0x2da   :  { %1359 = vmatpush.msrb.mxu1 %v2428_v32 }
 0x2dc   :  { %1360 = vmatpush.msrb.mxu1 %v2433_v33 }
 0x2dd   :  { %v491_v26 = vpop.f32.mrf.mxu0 }
 0x2de   :  { %v1851_v28 = vpop.eup %1850  ;;  %v492_v61 = vadd.f32 %v2540_v48, %v491_v26  ;;  %1361 = vmatpush.msrb.mxu1 %v2440_v34  ;;  %v2884_v26 = vld [vmem:[#allocation2 + $0xe8] sm:$0xff] }
 0x2df   :  { %568 = vmatmul.f32.gmra.mxu1 %v1851_v28 }
 0x2e0   :  { %1852 = vtanh.f32 %v492_v61  ;;  %942 = vmatmul.f32.gmra.mxu0 %v2835_v27  ;;  %1362 = vmatpush.msrb.mxu1 %v2451_v36  ;;  %v2851_v36 = vld [vmem:[#allocation2 + $0xa8] sm:$0xff] }
 0x2e2   :  { %1363 = vmatpush.msrb.mxu1 %v2459_v37 }
 0x2e4   :  { %1364 = vmatpush.msrb.mxu1 %v2464_v38 }
 0x2e5   :  { %v494_v29 = vpop.f32.mrf.mxu0 }
 0x2e6   :  { %v1853_v32 = vpop.eup %1852  ;;  %v495_v33 = vadd.f32 %v2540_v48, %v494_v29  ;;  %1365 = vmatpush.msrb.mxu1 %v2475_v40 }
 0x2e7   :  { %571 = vmatmul.f32.gmra.mxu1 %v1853_v32  ;;  %v2888_v32 = vld [vmem:[#allocation2 + $0xf0] sm:$0xff] }
 0x2e8   :  { %1854 = vtanh.f32 %v495_v33  ;;  %945 = vmatmul.f32.gmra.mxu0 %v2843_v31  ;;  %1366 = vmatpush.msrb.mxu1 %v2482_v41 }
 0x2ea   :  { %1367 = vmatpush.msrb.mxu1 %v2490_v42 }
 0x2ec   :  { %1368 = vmatpush.msrb.mxu1 %v2495_v43 }
 0x2ed   :  { %v497_v34 = vpop.f32.mrf.mxu0 }
 0x2ee   :  { %v1855_v37 = vpop.eup %1854  ;;  %v498_v38 = vadd.f32 %v2540_v48, %v497_v34  ;;  %1369 = vmatpush.msrb.mxu1 %v2506_v45  ;;  %v2893_v34 = vld [vmem:[%s3612_s2] ss:$0 sm:$0xff] }
 0x2ef   :  { %574 = vmatmul.f32.gmra.mxu1 %v1855_v37 }
 0x2f0   :  { %1856 = vtanh.f32 %v498_v38  ;;  %948 = vmatmul.f32.gmra.mxu0 %v2851_v36  ;;  %v2897_v38 = vld [vmem:[#allocation2 + $0xf8] sm:$0xff] }
 0x2f5   :  { %v500_v40 = vpop.f32.mrf.mxu0 }
 0x2f6   :  { %v1857_v41 = vpop.eup %1856  ;;  %v501_v42 = vadd.f32 %v2540_v48, %v500_v40 }
 0x2f7   :  { %577 = vmatmul.f32.gmra.mxu1 %v1857_v41 }
 0x2f8   :  { %1858 = vtanh.f32 %v501_v42  ;;  %951 = vmatmul.f32.gmra.mxu0 %v2856_v0 }
 0x2fd   :  { %v503_v43 = vpop.f32.mrf.mxu0 }
 0x2fe   :  { %v1859_v2 = vpop.eup %1858  ;;  %v504_v45 = vadd.f32 %v2540_v48, %v503_v43 }
 0x2ff   :  { %580 = vmatmul.f32.gmra.mxu1 %v1859_v2 }
 0x300   :  { %1860 = vtanh.f32 %v504_v45  ;;  %954 = vmatmul.f32.gmra.mxu0 %v2860_v24  ;;  %v789_v45 = vmul.f32 2.0, %v2721_v56  ;;  %v790_v56 = vmul.f32 2.0, %v2727_v50 }
 0x302   :  { %v806_v50 = vadd.f32 %v790_v56, %v2599_v58  ;;  %v791_v58 = vmul.f32 2.0, %v2736_v16 }
 0x305   :  { %v506_v4 = vpop.f32.mrf.mxu0 }
 0x306   :  { %v1861_v6 = vpop.eup %1860  ;;  %v507_v8 = vadd.f32 %v2540_v48, %v506_v4 }
 0x307   :  { %583 = vmatmul.f32.gmra.mxu1 %v1861_v6 }
 0x308   :  { %1862 = vtanh.f32 %v507_v8  ;;  %957 = vmatmul.f32.gmra.mxu0 %v2864_v25 }
 0x30d   :  { %v509_v30 = vpop.f32.mrf.mxu0 }
 0x30e   :  { %v1863_v12 = vpop.eup %1862  ;;  %v510_v35 = vadd.f32 %v2540_v48, %v509_v30 }
 0x30f   :  { %586 = vmatmul.f32.gmra.mxu1 %v1863_v12 }
 0x310   :  { %1864 = vtanh.f32 %v510_v35  ;;  %960 = vmatmul.f32.gmra.mxu0 %v2868_v10  ;;  %v805_v35 = vadd.f32 %v789_v45, %v2593_v54 }
 0x315   :  { %v512_v18 = vpop.f32.mrf.mxu0 }
 0x316   :  { %v1865_v39 = vpop.eup %1864  ;;  %v513_v15 = vadd.f32 %v2540_v48, %v512_v18 }
 0x317   :  { %589 = vmatmul.f32.gmra.mxu1 %v1865_v39 }
 0x318   :  { %1866 = vtanh.f32 %v513_v15  ;;  %963 = vmatmul.f32.gmra.mxu0 %v2872_v14  ;;  %v2906_v15 = vld [vmem:[#allocation2] sm:$0xff] }
 0x31d   :  { %v515_v49 = vpop.f32.mrf.mxu0 }
 0x31e   :  { %v1867_v21 = vpop.eup %1866  ;;  %v516_v55 = vadd.f32 %v2540_v48, %v515_v49 }
 0x31f   :  { %592 = vmatmul.f32.gmra.mxu1 %v1867_v21 }
 0x320   :  { %1868 = vtanh.f32 %v516_v55  ;;  %966 = vmatmul.f32.gmra.mxu0 %v2876_v44 }
 0x325   :  { %v518_v60 = vpop.f32.mrf.mxu0 }
 0x326   :  { %v1869_v47 = vpop.eup %1868  ;;  %v519_v51 = vadd.f32 %v2540_v48, %v518_v60  ;;  %v2040_v60 = vld [vmem:[%s3611_s1 + $0x78] sm:$0xff] }
 0x327   :  { %595 = vmatmul.f32.gmra.mxu1 %v1869_v47 }
 0x328   :  { %1870 = vtanh.f32 %v519_v51  ;;  %969 = vmatmul.f32.gmra.mxu0 %v2880_v22 }
 0x32d   :  { %v521_v23 = vpop.f32.mrf.mxu0 }
 0x32e   :  { %v1871_v28 = vpop.eup %1870  ;;  %v522_v61 = vadd.f32 %v2540_v48, %v521_v23 }
 0x32f   :  { %598 = vmatmul.f32.gmra.mxu1 %v1871_v28  ;;  %v2041_v28 = vld [vmem:[%s3611_s1 + $0x70] sm:$0xff] }
 0x330   :  { %1872 = vtanh.f32 %v522_v61  ;;  %972 = vmatmul.f32.gmra.mxu0 %v2884_v26 }
 0x335   :  { %v524_v29 = vpop.f32.mrf.mxu0 }
 0x336   :  { %v1873_v33 = vpop.eup %1872  ;;  %v525_v37 = vadd.f32 %v2893_v34, %v524_v29 }
 0x337   :  { %601 = vmatmul.f32.gmra.mxu1 %v1873_v33  ;;  %v2042_v33 = vld [vmem:[%s3611_s1 + $0x68] sm:$0xff] }
 0x338   :  { %1874 = vtanh.f32 %v525_v37  ;;  %975 = vmatmul.f32.gmra.mxu0 %v2888_v32  ;;  %v2924_v37 = vld [vmem:[#allocation2 + $0x8] sm:$0xff] }
 0x33d   :  { %v527_v48 = vpop.f32.mrf.mxu0 }
 0x33e   :  { %v1875_v40 = vpop.eup %1874  ;;  %v528_v41 = vadd.f32 %v2893_v34, %v527_v48 }
 0x33f   :  { %604 = vmatmul.f32.gmra.mxu1 %v1875_v40 }
 0x340   :  { %1876 = vtanh.f32 %v528_v41  ;;  %978 = vmatmul.f32.gmra.mxu0 %v2897_v38  ;;  %v2044_v41 = vld [vmem:[%s3611_s1 + $0x60] sm:$0xff] }
 0x345   :  { %v934_v42 = vpop.f32.mrf.mxu0 }
 0x346   :  { %v1877_v43 = vpop.eup %1876  ;;  %v935_v2 = vadd.f32 %v2893_v34, %v934_v42 }
 0x347   :  { %607 = vmatmul.f32.gmra.mxu1 %v1877_v43  ;;  %v2045_v43 = vld [vmem:[%s3611_s1 + $0x58] sm:$0xff] }
 0x348   :  { %1878 = vtanh.f32 %v935_v2 }
 0x34c   :  { %v563_v4 = vpop.f32.mrf.mxu1 }
 0x34d   :  { %v564_v6 = vadd.f32 %v2590_v52, %v563_v4  ;;  %v937_v8 = vpop.f32.mrf.mxu0 }
 0x34e   :  { %v1879_v30 = vpop.eup %1878  ;;  %v938_v12 = vadd.f32 %v2893_v34, %v937_v8  ;;  %v2046_v8 = vld [vmem:[%s3611_s1 + $0x50] sm:$0xff] }
 0x34f   :  { %v611_v18 = vmul.f32 0.025, %v564_v6  ;;  %v821_v39 = vmul.f32 2.0, %v564_v6  ;;  %1014 = vmatmul.f32.vlgmr.msra.gmra.mxu1 %v1879_v30  ;;  %v3644_v30 = vld [vmem:[#allocation8_spill] sm:$0xff] }
 0x350   :  { %1880 = vtanh.f32 %v938_v12  ;;  %v807_v16 = vadd.f32 %v791_v58, %v3644_v30  ;;  %v2966_v58 = vld [vmem:[#allocation2 + $0x18] sm:$0xff] }
 0x351   :  { %v627_v49 = vadd.f32 %v2906_v15, %v611_v18  ;;  %v2909_v21 = vadd.f32 %v821_v39, %v805_v35  ;;  %v2047_v18 = vld [vmem:[%s3611_s1 + $0x48] sm:$0xff]  ;;  %v2945_v39 = vld [vmem:[#allocation2 + $0x10] sm:$0xff] }
 0x353   :  { %659 = vmatmul.f32.vlgmr.msrb.gmra.mxu2 %v627_v49 }
 0x354   :  { %v566_v55 = vpop.f32.mrf.mxu1  ;;  %1451 = vmatpush.msrb.mxu2 %v2040_v60  ;;  %v792_v60 = vmul.f32 2.0, %v2745_v3 }
 0x355   :  { %v567_v54 = vadd.f32 %v2590_v52, %v566_v55  ;;  %v940_v47 = vpop.f32.mrf.mxu0  ;;  %v2049_v55 = vld [vmem:[%s3611_s1 + $0x40] sm:$0xff] }
 0x356   :  { %v1881_v51 = vpop.eup %1880  ;;  %v941_v23 = vadd.f32 %v2893_v34, %v940_v47  ;;  %1452 = vmatpush.msrb.mxu2 %v2041_v28  ;;  %v2050_v47 = vld [vmem:[%s3611_s1 + $0x38] sm:$0xff] }
 0x357   :  { %v822_v61 = vmul.f32 2.0, %v567_v54  ;;  %1017 = vmatmul.f32.gmra.mxu1 %v1881_v51  ;;  %v612_v29 = vmul.f32 0.025, %v567_v54 }
 0x358   :  { %1882 = vtanh.f32 %v941_v23  ;;  %1453 = vmatpush.msrb.mxu2 %v2042_v33 }
 0x359   :  { %v628_v48 = vadd.f32 %v2924_v37, %v612_v29  ;;  %v2927_v40 = vadd.f32 %v822_v61, %v806_v50  ;;  %v2051_v61 = vld [vmem:[%s3611_s1 + $0x30] sm:$0xff]  ;;  %v3645_v29 = vld [vmem:[#allocation9_spill] sm:$0xff] }
 0x35a   :  { %1454 = vmatpush.msrb.mxu2 %v2044_v41  ;;  %v808_v3 = vadd.f32 %v792_v60, %v3645_v29  ;;  %v2052_v41 = vld [vmem:[%s3611_s1 + $0x28] sm:$0xff] }
 0x35b   :  { %662 = vmatmul.f32.gmra.mxu2 %v628_v48  ;;  %v2057_v60 = vld [vmem:[%s3611_s1 + $0x8] sm:$0xff] }
 0x35c   :  { %v569_v42 = vpop.f32.mrf.mxu1  ;;  %1455 = vmatpush.msrb.mxu2 %v2045_v43 }
 0x35d   :  { %v570_v2 = vadd.f32 %v2590_v52, %v569_v42  ;;  %v943_v45 = vpop.f32.mrf.mxu0 }
 0x35e   :  { %v1883_v4 = vpop.eup %1882  ;;  %v944_v6 = vadd.f32 %v2893_v34, %v943_v45  ;;  %1456 = vmatpush.msrb.mxu2 %v2046_v8  ;;  %v793_v45 = vmul.f32 2.0, %v2754_v7 }
 0x35f   :  { %v823_v12 = vmul.f32 2.0, %v570_v2  ;;  %1020 = vmatmul.f32.gmra.mxu1 %v1883_v4  ;;  %v613_v35 = vmul.f32 0.025, %v570_v2  ;;  %v2054_v2 = vld [vmem:[%s3611_s1 + $0x20] sm:$0xff] }
 0x360   :  { %1884 = vtanh.f32 %v944_v6  ;;  %1457 = vmatpush.msrb.mxu2 %v2047_v18  ;;  %v2055_v6 = vld [vmem:[%s3611_s1 + $0x18] sm:$0xff]  ;;  %v3646_v18 = vld [vmem:[#allocation10_spill] sm:$0xff] }
 0x361   :  { %v629_v49 = vadd.f32 %v2945_v39, %v613_v35  ;;  %v2948_v56 = vadd.f32 %v823_v12, %v807_v16  ;;  %v2056_v35 = vld [vmem:[%s3611_s1 + $0x10] sm:$0xff]  ;;  %v809_v7 = vadd.f32 %v793_v45, %v3646_v18  ;;  %v2999_v45 = vld [vmem:[#allocation2 + $0x28] sm:$0xff]  ;;  %v3648_v18 = vld [vmem:[#allocation12_spill] sm:$0xff] }
 0x362   :  { %1458 = vmatpush.msrb.mxu2 %v2049_v55 }
 0x363   :  { %665 = vmatmul.f32.gmra.mxu2 %v629_v49 }
 0x364   :  { %v572_v54 = vpop.f32.mrf.mxu1  ;;  %1459 = vmatpush.msrb.mxu2 %v2050_v47 }
 0x365   :  { %v573_v51 = vadd.f32 %v2590_v52, %v572_v54  ;;  %v946_v23 = vpop.f32.mrf.mxu0  ;;  %v2987_v54 = vld [vmem:[#allocation2 + $0x20] sm:$0xff] }
 0x366   :  { %v1885_v28 = vpop.eup %1884  ;;  %v947_v50 = vadd.f32 %v2893_v34, %v946_v23  ;;  %1460 = vmatpush.msrb.mxu2 %v2051_v61  ;;  %v2059_v23 = vld [vmem:[%s3611_s1] sm:$0xff] }
 0x367   :  { %v824_v33 = vmul.f32 2.0, %v573_v51  ;;  %1023 = vmatmul.f32.gmra.mxu1 %v1885_v28  ;;  %v614_v48 = vmul.f32 0.025, %v573_v51  ;;  %v794_v28 = vmul.f32 2.0, %v2762_v11  ;;  %v795_v11 = vmul.f32 2.0, %v2767_v13  ;;  %v3013_v13 = vld [vmem:[#allocation2 + $0x30] sm:$0xff] }
 0x368   :  { %1886 = vtanh.f32 %v947_v50  ;;  %1461 = vmatpush.msrb.mxu2 %v2052_v41 }
 0x369   :  { %v630_v42 = vadd.f32 %v2966_v58, %v614_v48  ;;  %v2969_v43 = vadd.f32 %v824_v33, %v808_v3  ;;  %v3647_v48 = vld [vmem:[#allocation11_spill] sm:$0xff] }
 0x36a   :  { %1462 = vmatpush.msrb.mxu2 %v2054_v2  ;;  %v810_v41 = vadd.f32 %v794_v28, %v3647_v48 }
 0x36b   :  { %668 = vmatmul.f32.gmra.mxu2 %v630_v42 }
 0x36c   :  { %v575_v4 = vpop.f32.mrf.mxu1  ;;  %1463 = vmatpush.msrb.mxu2 %v2055_v6 }
 0x36d   :  { %v576_v8 = vadd.f32 %v2590_v52, %v575_v4  ;;  %v949_v30 = vpop.f32.mrf.mxu0 }
 0x36e   :  { %v1887_v16 = vpop.eup %1886  ;;  %v950_v12 = vadd.f32 %v2893_v34, %v949_v30  ;;  %1464 = vmatpush.msrb.mxu2 %v2056_v35 }
 0x36f   :  { %v825_v49 = vmul.f32 2.0, %v576_v8  ;;  %1026 = vmatmul.f32.gmra.mxu1 %v1887_v16  ;;  %v615_v55 = vmul.f32 0.025, %v576_v8  ;;  %v3008_v8 = vld [vmem:[%s3614_s4] ss:$0 sm:$0xff] }
 0x370   :  { %1888 = vtanh.f32 %v950_v12  ;;  %1465 = vmatpush.msrb.mxu2 %v2057_v60 }
 0x371   :  { %v631_v47 = vadd.f32 %v2987_v54, %v615_v55  ;;  %v2990_v51 = vadd.f32 %v825_v49, %v809_v7  ;;  %v811_v7 = vadd.f32 %v795_v11, %v3648_v18  ;;  %v3650_v18 = vld [vmem:[#allocation14_spill] sm:$0xff] }
 0x372   :  { %1466 = vmatpush.msrb.mxu2 %v2059_v23  ;;  %v796_v23 = vmul.f32 2.0, %v2772_v20  ;;  %v797_v20 = vmul.f32 2.0, %v2777_v63  ;;  %v798_v63 = vmul.f32 2.0, %v2782_v62  ;;  %v799_v62 = vmul.f32 2.0, %v2787_v59 }
 0x373   :  { %671 = vmatmul.f32.gmra.mxu2 %v631_v47  ;;  %v800_v59 = vmul.f32 2.0, %v2792_v1  ;;  %v801_v1 = vmul.f32 2.0, %v2797_v5  ;;  %v802_v5 = vmul.f32 2.0, %v2802_v9  ;;  %v803_v9 = vmul.f32 2.0, %v2807_v17 }
 0x374   :  { %v578_v50 = vpop.f32.mrf.mxu1  ;;  %v804_v17 = vmul.f32 2.0, %v2812_v19 }
 0x375   :  { %v579_v61 = vadd.f32 %v2590_v52, %v578_v50  ;;  %v952_v29 = vpop.f32.mrf.mxu0 }
 0x376   :  { %v1889_v3 = vpop.eup %1888  ;;  %v953_v33 = vadd.f32 %v2893_v34, %v952_v29 }
 0x377   :  { %v826_v42 = vmul.f32 2.0, %v579_v61  ;;  %1029 = vmatmul.f32.gmra.mxu1 %v1889_v3  ;;  %v616_v2 = vmul.f32 0.025, %v579_v61 }
 0x378   :  { %1890 = vtanh.f32 %v953_v33  ;;  %v3649_v33 = vld [vmem:[#allocation13_spill] sm:$0xff] }
 0x379   :  { %v632_v4 = vadd.f32 %v2999_v45, %v616_v2  ;;  %v3002_v6 = vadd.f32 %v826_v42, %v810_v41  ;;  %v812_v48 = vadd.f32 %v796_v23, %v3649_v33  ;;  %v3022_v2 = vld [vmem:[#allocation2 + $0x38] sm:$0xff] }
 0x37b   :  { %674 = vmatmul.f32.gmra.mxu2 %v632_v4 }
 0x37c   :  { %v581_v52 = vpop.f32.mrf.mxu1 }
 0x37d   :  { %v582_v30 = vadd.f32 %v3008_v8, %v581_v52  ;;  %v955_v16 = vpop.f32.mrf.mxu0 }
 0x37e   :  { %v1891_v12 = vpop.eup %1890  ;;  %v956_v35 = vadd.f32 %v2893_v34, %v955_v16 }
 0x37f   :  { %v827_v49 = vmul.f32 2.0, %v582_v30  ;;  %1032 = vmatmul.f32.gmra.mxu1 %v1891_v12  ;;  %v617_v55 = vmul.f32 0.025, %v582_v30 }
 0x380   :  { %1892 = vtanh.f32 %v956_v35 }
 0x381   :  { %v633_v60 = vadd.f32 %v3013_v13, %v617_v55  ;;  %v3016_v47 = vadd.f32 %v827_v49, %v811_v7  ;;  %v813_v7 = vadd.f32 %v797_v20, %v3650_v18  ;;  %v3040_v20 = vld [vmem:[#allocation2 + $0x48] sm:$0xff] }
 0x383   :  { %677 = vmatmul.f32.gmra.mxu2 %v633_v60  ;;  %v3031_v60 = vld [vmem:[#allocation2 + $0x40] sm:$0xff] }
 0x384   :  { %v584_v28 = vpop.f32.mrf.mxu1 }
 0x385   :  { %v585_v50 = vadd.f32 %v3008_v8, %v584_v28  ;;  %v958_v61 = vpop.f32.mrf.mxu0 }
 0x386   :  { %v1893_v29 = vpop.eup %1892  ;;  %v959_v3 = vadd.f32 %v2893_v34, %v958_v61 }
 0x387   :  { %v828_v41 = vmul.f32 2.0, %v585_v50  ;;  %1035 = vmatmul.f32.gmra.mxu1 %v1893_v29  ;;  %v618_v42 = vmul.f32 0.025, %v585_v50 }
 0x388   :  { %1894 = vtanh.f32 %v959_v3 }
 0x389   :  { %v634_v4 = vadd.f32 %v3022_v2, %v618_v42  ;;  %v3025_v11 = vadd.f32 %v828_v41, %v812_v48  ;;  %v3651_v48 = vld [vmem:[#allocation15_spill] sm:$0xff] }
 0x38a   :  { %v814_v41 = vadd.f32 %v798_v63, %v3651_v48 }
 0x38b   :  { %680 = vmatmul.f32.gmra.mxu2 %v634_v4 }
 0x38c   :  { %v587_v52 = vpop.f32.mrf.mxu1 }
 0x38d   :  { %v588_v30 = vadd.f32 %v3008_v8, %v587_v52  ;;  %v961_v16 = vpop.f32.mrf.mxu0 }
 0x38e   :  { %v1895_v12 = vpop.eup %1894  ;;  %v962_v35 = vadd.f32 %v2893_v34, %v961_v16 }
 0x38f   :  { %v619_v49 = vmul.f32 0.025, %v588_v30  ;;  %v829_v55 = vmul.f32 2.0, %v588_v30  ;;  %1038 = vmatmul.f32.gmra.mxu1 %v1895_v12 }
 0x390   :  { %1896 = vtanh.f32 %v962_v35 }
 0x391   :  { %v635_v23 = vadd.f32 %v3031_v60, %v619_v49  ;;  %v3034_v28 = vadd.f32 %v829_v55, %v813_v7  ;;  %v3652_v49 = vld [vmem:[#allocation16_spill] sm:$0xff] }
 0x392   :  { %v815_v55 = vadd.f32 %v799_v62, %v3652_v49 }
 0x393   :  { %683 = vmatmul.f32.gmra.mxu2 %v635_v23 }
 0x394   :  { %v590_v50 = vpop.f32.mrf.mxu1 }
 0x395   :  { %v591_v61 = vadd.f32 %v3008_v8, %v590_v50  ;;  %v964_v29 = vpop.f32.mrf.mxu0  ;;  %v3049_v50 = vld [vmem:[#allocation2 + $0x50] sm:$0xff] }
 0x396   :  { %v1897_v3 = vpop.eup %1896  ;;  %v965_v33 = vadd.f32 %v2893_v34, %v964_v29 }
 0x397   :  { %v620_v42 = vmul.f32 0.025, %v591_v61  ;;  %v830_v4 = vmul.f32 2.0, %v591_v61  ;;  %1041 = vmatmul.f32.gmra.mxu1 %v1897_v3 }
 0x398   :  { %1898 = vtanh.f32 %v965_v33 }
 0x399   :  { %v636_v52 = vadd.f32 %v3040_v20, %v620_v42  ;;  %v3043_v30 = vadd.f32 %v830_v4, %v814_v41  ;;  %v3653_v4 = vld [vmem:[#allocation17_spill] sm:$0xff] }
 0x39b   :  { %686 = vmatmul.f32.gmra.mxu2 %v636_v52  ;;  %v816_v52 = vadd.f32 %v800_v59, %v3653_v4 }
 0x39c   :  { %v593_v16 = vpop.f32.mrf.mxu1 }
 0x39d   :  { %v594_v12 = vadd.f32 %v3008_v8, %v593_v16  ;;  %v967_v35 = vpop.f32.mrf.mxu0 }
 0x39e   :  { %v1899_v18 = vpop.eup %1898  ;;  %v968_v7 = vadd.f32 %v2893_v34, %v967_v35 }
 0x39f   :  { %v621_v23 = vmul.f32 0.025, %v594_v12  ;;  %v831_v63 = vmul.f32 2.0, %v594_v12  ;;  %1044 = vmatmul.f32.gmra.mxu1 %v1899_v18  ;;  %v3058_v12 = vld [vmem:[#allocation2 + $0x58] sm:$0xff] }
 0x3a0   :  { %1900 = vtanh.f32 %v968_v7 }
 0x3a1   :  { %v637_v61 = vadd.f32 %v3049_v50, %v621_v23  ;;  %v3052_v29 = vadd.f32 %v831_v63, %v815_v55 }
 0x3a3   :  { %689 = vmatmul.f32.gmra.mxu2 %v637_v61  ;;  %v3654_v61 = vld [vmem:[#allocation18_spill] sm:$0xff] }
 0x3a4   :  { %v596_v3 = vpop.f32.mrf.mxu1  ;;  %v817_v59 = vadd.f32 %v801_v1, %v3654_v61  ;;  %v3655_v1 = vld [vmem:[#allocation19_spill] sm:$0xff] }
 0x3a5   :  { %v597_v33 = vadd.f32 %v3008_v8, %v596_v3  ;;  %v970_v48 = vpop.f32.mrf.mxu0 }
 0x3a6   :  { %v1901_v41 = vpop.eup %1900  ;;  %v971_v42 = vadd.f32 %v2893_v34, %v970_v48  ;;  %v3067_v48 = vld [vmem:[#allocation2 + $0x60] sm:$0xff] }
 0x3a7   :  { %v622_v62 = vmul.f32 0.025, %v597_v33  ;;  %v832_v16 = vmul.f32 2.0, %v597_v33  ;;  %1047 = vmatmul.f32.gmra.mxu1 %v1901_v41 }
 0x3a8   :  { %1902 = vtanh.f32 %v971_v42 }
 0x3a9   :  { %v638_v35 = vadd.f32 %v3058_v12, %v622_v62  ;;  %v3061_v18 = vadd.f32 %v832_v16, %v816_v52 }
 0x3ab   :  { %692 = vmatmul.f32.gmra.mxu2 %v638_v35 }
 0x3ac   :  { %v599_v7 = vpop.f32.mrf.mxu1 }
 0x3ad   :  { %v600_v49 = vadd.f32 %v3008_v8, %v599_v7  ;;  %v973_v55 = vpop.f32.mrf.mxu0  ;;  %v818_v7 = vadd.f32 %v802_v5, %v3655_v1 }
 0x3ae   :  { %v1903_v23 = vpop.eup %1902  ;;  %v974_v63 = vadd.f32 %v2893_v34, %v973_v55 }
 0x3af   :  { %v623_v3 = vmul.f32 0.025, %v600_v49  ;;  %v833_v33 = vmul.f32 2.0, %v600_v49  ;;  %1050 = vmatmul.f32.gmra.mxu1 %v1903_v23  ;;  %v3076_v23 = vld [vmem:[#allocation2 + $0x68] sm:$0xff] }
 0x3b0   :  { %1904 = vtanh.f32 %v974_v63 }
 0x3b1   :  { %v639_v41 = vadd.f32 %v3067_v48, %v623_v3  ;;  %v3070_v42 = vadd.f32 %v833_v33, %v817_v59 }
 0x3b3   :  { %695 = vmatmul.f32.gmra.mxu2 %v639_v41 }
 0x3b4   :  { %v602_v4 = vpop.f32.mrf.mxu1 }
 0x3b5   :  { %v603_v52 = vadd.f32 %v3008_v8, %v602_v4  ;;  %v976_v62 = vpop.f32.mrf.mxu0  ;;  %v3656_v4 = vld [vmem:[#allocation20_spill] sm:$0xff] }
 0x3b6   :  { %v1905_v16 = vpop.eup %1904  ;;  %v977_v35 = vadd.f32 %v2893_v34, %v976_v62 }
 0x3b7   :  { %v624_v49 = vmul.f32 0.025, %v603_v52  ;;  %v834_v55 = vmul.f32 2.0, %v603_v52  ;;  %1053 = vmatmul.f32.gmra.mxu1 %v1905_v16  ;;  %v819_v52 = vadd.f32 %v803_v9, %v3656_v4 }
 0x3b8   :  { %1906 = vtanh.f32 %v977_v35  ;;  %v3085_v35 = vld [vmem:[#allocation2 + $0x70] sm:$0xff] }
 0x3b9   :  { %v640_v63 = vadd.f32 %v3076_v23, %v624_v49  ;;  %v3079_v61 = vadd.f32 %v834_v55, %v818_v7 }
 0x3bb   :  { %698 = vmatmul.f32.gmra.mxu2 %v640_v63 }
 0x3bc   :  { %v605_v59 = vpop.f32.mrf.mxu1 }
 0x3bd   :  { %v606_v3 = vadd.f32 %v3008_v8, %v605_v59  ;;  %v979_v33 = vpop.f32.mrf.mxu0  ;;  %v3657_v59 = vld [vmem:[#allocation21_spill] sm:$0xff] }
 0x3be   :  { %v1907_v41 = vpop.eup %1906  ;;  %v980_v5 = vadd.f32 %v2893_v34, %v979_v33  ;;  %v820_v33 = vadd.f32 %v804_v17, %v3657_v59 }
 0x3bf   :  { %v625_v62 = vmul.f32 0.025, %v606_v3  ;;  %v835_v16 = vmul.f32 2.0, %v606_v3  ;;  %1056 = vmatmul.f32.gmra.mxu1 %v1907_v41  ;;  %v3093_v3 = vld [vmem:[#allocation2 + $0x78] sm:$0xff] }
 0x3c0   :  { %1908 = vtanh.f32 %v980_v5 }
 0x3c1   :  { %v641_v1 = vadd.f32 %v3085_v35, %v625_v62  ;;  %v3088_v7 = vadd.f32 %v835_v16, %v819_v52 }
 0x3c3   :  { %701 = vmatmul.f32.gmra.mxu2 %v641_v1 }
 0x3c4   :  { %v608_v49 = vpop.f32.mrf.mxu1 }
 0x3c5   :  { %v609_v55 = vadd.f32 %v3008_v8, %v608_v49 }
 0x3c6   :  { %v1909_v63 = vpop.eup %1908 }
 0x3c7   :  { %v626_v9 = vmul.f32 0.025, %v609_v55  ;;  %v836_v4 = vmul.f32 2.0, %v609_v55  ;;  %1059 = vmatmul.f32.gmra.mxu1 %v1909_v63 }
 0x3c9   :  { %v642_v41 = vadd.f32 %v3093_v3, %v626_v9  ;;  %v3096_v5 = vadd.f32 %v836_v4, %v820_v33 }
 0x3cb   :  { %704 = vmatmul.f32.gmra.mxu2 %v642_v41 }
 0x3cc   :  { %v1015_v52 = vpop.f32.mrf.mxu1 }
 0x3cd   :  { %v3099_v19 = vadd.f32 %v3008_v8, %v1015_v52 }
 0x3cf   :  { %v1063_v62 = vmul.f32 0.05, %v3099_v19 }
 0x3d1   :  { %v1079_v16 = vadd.f32 %v1063_v62, %v2816_v53 }
 0x3d3   :  { %1111 = vmatmul.f32.vlgmr.msra.gmra.mxu2 %v1079_v16  ;;  %v2072_v16 = vld [vmem:[%s3613_s3 + $0x78] sm:$0xff] }
 0x3d4   :  { %v1018_v1 = vpop.f32.mrf.mxu1 }
 0x3d5   :  { %v3104_v17 = vadd.f32 %v3008_v8, %v1018_v1 }
 0x3d6   :  { %v660_v49 = vpop.f32.mrf.mxu2 }
 0x3d7   :  { %v1064_v55 = vmul.f32 0.05, %v3104_v17  ;;  %v661_v63 = vadd.f32 %v2893_v34, %v660_v49 }
 0x3d9   :  { %1910 = vtanh.f32 %v661_v63  ;;  %v1080_v59 = vadd.f32 %v1064_v55, %v2820_v46  ;;  %v2073_v46 = vld [vmem:[%s3613_s3 + $0x70] sm:$0xff]  ;;  %v2074_v55 = vld [vmem:[%s3613_s3 + $0x68] sm:$0xff] }
 0x3db   :  { %1114 = vmatmul.f32.gmra.mxu2 %v1080_v59 }
 0x3dc   :  { %v1021_v33 = vpop.f32.mrf.mxu1 }
 0x3dd   :  { %v3110_v9 = vadd.f32 %v3008_v8, %v1021_v33 }
 0x3de   :  { %v663_v4 = vpop.f32.mrf.mxu2 }
 0x3df   :  { %v1911_v53 = vpop.eup %1910  ;;  %v1065_v41 = vmul.f32 0.05, %v3110_v9  ;;  %v664_v52 = vadd.f32 %v2893_v34, %v663_v4  ;;  %v2075_v4 = vld [vmem:[%s3613_s3 + $0x60] sm:$0xff] }
 0x3e0   :  { %740 = vmatmul.f32.vlgmr.msrb.gmra.mxu3 %v1911_v53 }
 0x3e1   :  { %1912 = vtanh.f32 %v664_v52  ;;  %v1081_v62 = vadd.f32 %v1065_v41, %v2827_v57  ;;  %1532 = vmatpush.msrb.mxu3 %v2072_v16  ;;  %v2076_v41 = vld [vmem:[%s3613_s3 + $0x58] sm:$0xff]  ;;  %v2077_v52 = vld [vmem:[%s3613_s3 + $0x50] sm:$0xff] }
 0x3e3   :  { %1117 = vmatmul.f32.gmra.mxu2 %v1081_v62  ;;  %1533 = vmatpush.msrb.mxu3 %v2073_v46  ;;  %v2078_v46 = vld [vmem:[%s3613_s3 + $0x48] sm:$0xff] }
 0x3e4   :  { %v1024_v1 = vpop.f32.mrf.mxu1 }
 0x3e5   :  { %v3122_v49 = vadd.f32 %v3008_v8, %v1024_v1  ;;  %1534 = vmatpush.msrb.mxu3 %v2074_v55 }
 0x3e6   :  { %v666_v57 = vpop.f32.mrf.mxu2 }
 0x3e7   :  { %v1913_v63 = vpop.eup %1912  ;;  %v1066_v59 = vmul.f32 0.05, %v3122_v49  ;;  %v667_v33 = vadd.f32 %v2893_v34, %v666_v57  ;;  %1535 = vmatpush.msrb.mxu3 %v2075_v4  ;;  %v2081_v4 = vld [vmem:[%s3613_s3 + $0x30] sm:$0xff] }
 0x3e8   :  { %743 = vmatmul.f32.gmra.mxu3 %v1913_v63  ;;  %v2079_v63 = vld [vmem:[%s3613_s3 + $0x40] sm:$0xff] }
 0x3e9   :  { %1914 = vtanh.f32 %v667_v33  ;;  %v1082_v53 = vadd.f32 %v1066_v59, %v2835_v27  ;;  %1536 = vmatpush.msrb.mxu3 %v2076_v41  ;;  %v2080_v33 = vld [vmem:[%s3613_s3 + $0x38] sm:$0xff] }
 0x3eb   :  { %1120 = vmatmul.f32.gmra.mxu2 %v1082_v53  ;;  %1537 = vmatpush.msrb.mxu3 %v2077_v52  ;;  %v2082_v52 = vld [vmem:[%s3613_s3 + $0x28] sm:$0xff] }
 0x3ec   :  { %v1027_v62 = vpop.f32.mrf.mxu1 }
 0x3ed   :  { %v3140_v16 = vadd.f32 %v3008_v8, %v1027_v62  ;;  %1538 = vmatpush.msrb.mxu3 %v2078_v46 }
 0x3ee   :  { %v669_v27 = vpop.f32.mrf.mxu2 }
 0x3ef   :  { %v1915_v1 = vpop.eup %1914  ;;  %v1067_v55 = vmul.f32 0.05, %v3140_v16  ;;  %v670_v57 = vadd.f32 %v2893_v34, %v669_v27  ;;  %1539 = vmatpush.msrb.mxu3 %v2079_v63  ;;  %v2085_v63 = vld [vmem:[%s3613_s3 + $0x10] sm:$0xff] }
 0x3f0   :  { %746 = vmatmul.f32.gmra.mxu3 %v1915_v1  ;;  %v2083_v1 = vld [vmem:[%s3613_s3 + $0x20] sm:$0xff] }
 0x3f1   :  { %1916 = vtanh.f32 %v670_v57  ;;  %v1083_v59 = vadd.f32 %v1067_v55, %v2843_v31  ;;  %1540 = vmatpush.msrb.mxu3 %v2080_v33  ;;  %v2084_v57 = vld [vmem:[%s3613_s3 + $0x18] sm:$0xff] }
 0x3f3   :  { %1123 = vmatmul.f32.gmra.mxu2 %v1083_v59  ;;  %1541 = vmatpush.msrb.mxu3 %v2081_v4  ;;  %v2086_v4 = vld [vmem:[%s3613_s3 + $0x8] sm:$0xff] }
 0x3f4   :  { %v1030_v53 = vpop.f32.mrf.mxu1 }
 0x3f5   :  { %v3158_v41 = vadd.f32 %v3008_v8, %v1030_v53  ;;  %1542 = vmatpush.msrb.mxu3 %v2082_v52 }
 0x3f6   :  { %v672_v31 = vpop.f32.mrf.mxu2 }
 0x3f7   :  { %v1917_v62 = vpop.eup %1916  ;;  %v1068_v46 = vmul.f32 0.05, %v3158_v41  ;;  %v673_v27 = vadd.f32 %v2893_v34, %v672_v31  ;;  %1543 = vmatpush.msrb.mxu3 %v2083_v1 }
 0x3f8   :  { %749 = vmatmul.f32.gmra.mxu3 %v1917_v62  ;;  %v2087_v62 = vld [vmem:[%s3613_s3] sm:$0xff] }
 0x3f9   :  { %1918 = vtanh.f32 %v673_v27  ;;  %v1084_v55 = vadd.f32 %v1068_v46, %v2851_v36  ;;  %1544 = vmatpush.msrb.mxu3 %v2084_v57 }
 0x3fb   :  { %1126 = vmatmul.f32.gmra.mxu2 %v1084_v55  ;;  %1545 = vmatpush.msrb.mxu3 %v2085_v63 }
 0x3fc   :  { %v1033_v59 = vpop.f32.mrf.mxu1 }
 0x3fd   :  { %v3176_v33 = vadd.f32 %v3008_v8, %v1033_v59  ;;  %1546 = vmatpush.msrb.mxu3 %v2086_v4 }
 0x3fe   :  { %v675_v36 = vpop.f32.mrf.mxu2 }
 0x3ff   :  { %v1919_v53 = vpop.eup %1918  ;;  %v1069_v52 = vmul.f32 0.05, %v3176_v33  ;;  %v676_v31 = vadd.f32 %v2893_v34, %v675_v36  ;;  %1547 = vmatpush.msrb.mxu3 %v2087_v62 }
 0x400   :  { %752 = vmatmul.f32.gmra.mxu3 %v1919_v53 }
 0x401   :  { %1920 = vtanh.f32 %v676_v31  ;;  %v1085_v46 = vadd.f32 %v1069_v52, %v2856_v0 }
 0x403   :  { %1129 = vmatmul.f32.gmra.mxu2 %v1085_v46 }
 0x404   :  { %v1036_v27 = vpop.f32.mrf.mxu1 }
 0x405   :  { %v3188_v1 = vadd.f32 %v3008_v8, %v1036_v27 }
 0x406   :  { %v678_v55 = vpop.f32.mrf.mxu2 }
 0x407   :  { %v1921_v57 = vpop.eup %1920  ;;  %v1070_v63 = vmul.f32 0.05, %v3188_v1  ;;  %v679_v59 = vadd.f32 %v2893_v34, %v678_v55 }
 0x408   :  { %755 = vmatmul.f32.gmra.mxu3 %v1921_v57 }
 0x409   :  { %1922 = vtanh.f32 %v679_v59  ;;  %v1086_v4 = vadd.f32 %v1070_v63, %v2860_v24 }
 0x40b   :  { %1132 = vmatmul.f32.gmra.mxu2 %v1086_v4 }
 0x40c   :  { %v1039_v36 = vpop.f32.mrf.mxu1 }
 0x40d   :  { %v3194_v53 = vadd.f32 %v3008_v8, %v1039_v36 }
 0x40e   :  { %v681_v0 = vpop.f32.mrf.mxu2 }
 0x40f   :  { %v1923_v52 = vpop.eup %1922  ;;  %v1071_v31 = vmul.f32 0.05, %v3194_v53  ;;  %v682_v62 = vadd.f32 %v2893_v34, %v681_v0 }
 0x410   :  { %758 = vmatmul.f32.gmra.mxu3 %v1923_v52 }
 0x411   :  { %1924 = vtanh.f32 %v682_v62  ;;  %v1087_v46 = vadd.f32 %v1071_v31, %v2864_v25 }
 0x413   :  { %1135 = vmatmul.f32.gmra.mxu2 %v1087_v46 }
 0x414   :  { %v1042_v27 = vpop.f32.mrf.mxu1 }
 0x415   :  { %v3200_v55 = vadd.f32 %v3008_v8, %v1042_v27 }
 0x416   :  { %v684_v24 = vpop.f32.mrf.mxu2 }
 0x417   :  { %v1925_v57 = vpop.eup %1924  ;;  %v1072_v63 = vmul.f32 0.05, %v3200_v55  ;;  %v685_v59 = vadd.f32 %v2893_v34, %v684_v24 }
 0x418   :  { %761 = vmatmul.f32.gmra.mxu3 %v1925_v57 }
 0x419   :  { %1926 = vtanh.f32 %v685_v59  ;;  %v1088_v4 = vadd.f32 %v1072_v63, %v2868_v10 }
 0x41b   :  { %1138 = vmatmul.f32.gmra.mxu2 %v1088_v4 }
 0x41c   :  { %v1045_v36 = vpop.f32.mrf.mxu1 }
 0x41d   :  { %v3206_v0 = vadd.f32 %v3008_v8, %v1045_v36 }
 0x41e   :  { %v687_v25 = vpop.f32.mrf.mxu2 }
 0x41f   :  { %v1927_v52 = vpop.eup %1926  ;;  %v1073_v31 = vmul.f32 0.05, %v3206_v0  ;;  %v688_v62 = vadd.f32 %v2893_v34, %v687_v25 }
 0x420   :  { %764 = vmatmul.f32.gmra.mxu3 %v1927_v52 }
 0x421   :  { %1928 = vtanh.f32 %v688_v62  ;;  %v1089_v46 = vadd.f32 %v1073_v31, %v2872_v14 }
 0x423   :  { %1141 = vmatmul.f32.gmra.mxu2 %v1089_v46 }
 0x424   :  { %v1048_v27 = vpop.f32.mrf.mxu1 }
 0x425   :  { %v3212_v24 = vadd.f32 %v3008_v8, %v1048_v27 }
 0x426   :  { %v690_v10 = vpop.f32.mrf.mxu2 }
 0x427   :  { %v1929_v57 = vpop.eup %1928  ;;  %v1074_v63 = vmul.f32 0.05, %v3212_v24  ;;  %v691_v59 = vadd.f32 %v2893_v34, %v690_v10 }
 0x428   :  { %767 = vmatmul.f32.gmra.mxu3 %v1929_v57 }
 0x429   :  { %1930 = vtanh.f32 %v691_v59  ;;  %v1090_v4 = vadd.f32 %v1074_v63, %v2876_v44 }
 0x42b   :  { %1144 = vmatmul.f32.gmra.mxu2 %v1090_v4 }
 0x42c   :  { %v1051_v36 = vpop.f32.mrf.mxu1 }
 0x42d   :  { %v3218_v25 = vadd.f32 %v3008_v8, %v1051_v36 }
 0x42e   :  { %v693_v14 = vpop.f32.mrf.mxu2 }
 0x42f   :  { %v1931_v52 = vpop.eup %1930  ;;  %v1075_v31 = vmul.f32 0.05, %v3218_v25  ;;  %v694_v62 = vadd.f32 %v2893_v34, %v693_v14 }
 0x430   :  { %770 = vmatmul.f32.gmra.mxu3 %v1931_v52 }
 0x431   :  { %1932 = vtanh.f32 %v694_v62  ;;  %v1091_v46 = vadd.f32 %v1075_v31, %v2880_v22 }
 0x433   :  { %1147 = vmatmul.f32.gmra.mxu2 %v1091_v46 }
 0x434   :  { %v1054_v27 = vpop.f32.mrf.mxu1 }
 0x435   :  { %v3224_v10 = vadd.f32 %v3008_v8, %v1054_v27 }
 0x436   :  { %v696_v44 = vpop.f32.mrf.mxu2 }
 0x437   :  { %v1933_v57 = vpop.eup %1932  ;;  %v1076_v63 = vmul.f32 0.05, %v3224_v10  ;;  %v697_v59 = vadd.f32 %v2893_v34, %v696_v44 }
 0x438   :  { %773 = vmatmul.f32.gmra.mxu3 %v1933_v57 }
 0x439   :  { %1934 = vtanh.f32 %v697_v59  ;;  %v1092_v4 = vadd.f32 %v1076_v63, %v2884_v26 }
 0x43b   :  { %1150 = vmatmul.f32.gmra.mxu2 %v1092_v4 }
 0x43c   :  { %v1057_v36 = vpop.f32.mrf.mxu1 }
 0x43d   :  { %v3230_v14 = vadd.f32 %v3008_v8, %v1057_v36 }
 0x43e   :  { %v699_v22 = vpop.f32.mrf.mxu2 }
 0x43f   :  { %v1935_v52 = vpop.eup %1934  ;;  %v1077_v31 = vmul.f32 0.05, %v3230_v14  ;;  %v700_v62 = vadd.f32 %v2893_v34, %v699_v22 }
 0x440   :  { %776 = vmatmul.f32.gmra.mxu3 %v1935_v52 }
 0x441   :  { %1936 = vtanh.f32 %v700_v62  ;;  %v1093_v46 = vadd.f32 %v1077_v31, %v2888_v32 }
 0x443   :  { %1153 = vmatmul.f32.gmra.mxu2 %v1093_v46 }
 0x444   :  { %v1060_v27 = vpop.f32.mrf.mxu1 }
 0x445   :  { %v3236_v44 = vadd.f32 %v3008_v8, %v1060_v27 }
 0x446   :  { %v702_v26 = vpop.f32.mrf.mxu2 }
 0x447   :  { %v1937_v57 = vpop.eup %1936  ;;  %v1078_v63 = vmul.f32 0.05, %v3236_v44  ;;  %v703_v59 = vadd.f32 %v2893_v34, %v702_v26 }
 0x448   :  { %779 = vmatmul.f32.gmra.mxu3 %v1937_v57 }
 0x449   :  { %1938 = vtanh.f32 %v703_v59  ;;  %v1094_v4 = vadd.f32 %v1078_v63, %v2897_v38 }
 0x44b   :  { %1156 = vmatmul.f32.gmra.mxu2 %v1094_v4 }
 0x44e   :  { %v705_v36 = vpop.f32.mrf.mxu2 }
 0x44f   :  { %v1939_v22 = vpop.eup %1938  ;;  %v706_v32 = vadd.f32 %v2893_v34, %v705_v36 }
 0x450   :  { %782 = vmatmul.f32.gmra.mxu3 %v1939_v22 }
 0x451   :  { %1940 = vtanh.f32 %v706_v32 }
 0x456   :  { %v1112_v52 = vpop.f32.mrf.mxu2 }
 0x457   :  { %v1941_v31 = vpop.eup %1940  ;;  %v1113_v62 = vadd.f32 %v2893_v34, %v1112_v52 }
 0x458   :  { %785 = vmatmul.f32.gmra.mxu3 %v1941_v31 }
 0x459   :  { %1942 = vtanh.f32 %v1113_v62 }
 0x45e   :  { %v1115_v46 = vpop.f32.mrf.mxu2 }
 0x45f   :  { %v1943_v27 = vpop.eup %1942  ;;  %v1116_v26 = vadd.f32 %v2893_v34, %v1115_v46 }
 0x460   :  { %1192 = vmatmul.f32.vlgmr.msra.gmra.mxu3 %v1943_v27 }
 0x461   :  { %1944 = vtanh.f32 %v1116_v26 }
 0x463   :  { %v741_v38 = vpop.f32.mrf.mxu3 }
 0x464   :  { %v742_v57 = vadd.f32 %v3008_v8, %v741_v38 }
 0x466   :  { %v853_v63 = vadd.f32 %v2909_v21, %v742_v57  ;;  %v1118_v59 = vpop.f32.mrf.mxu2 }
 0x467   :  { %v1945_v4 = vpop.eup %1944  ;;  %v1119_v36 = vadd.f32 %v2893_v34, %v1118_v59 }
 0x468   :  { %v869_v22 = vmul.f32 0.16666667, %v853_v63  ;;  %1195 = vmatmul.f32.gmra.mxu3 %v1945_v4 }
 0x469   :  { %1946 = vtanh.f32 %v1119_v36 }
 0x46a   :  { %v885_v32 = vmul.f32 0.05, %v869_v22 }
 0x46b   :  { %v744_v52 = vpop.f32.mrf.mxu3 }
 0x46c   :  { %v901_v31 = vadd.f32 %v2906_v15, %v885_v32  ;;  %v745_v62 = vadd.f32 %v3008_v8, %v744_v52 }
 0x46e   :  { %1725 = vst [vmem:[#allocation5] sm:$0xff] %v901_v31  ;;  %v854_v46 = vadd.f32 %v2927_v40, %v745_v62  ;;  %v1121_v27 = vpop.f32.mrf.mxu2 }
 0x46f   :  { %v1947_v26 = vpop.eup %1946  ;;  %v1122_v21 = vadd.f32 %v2893_v34, %v1121_v27 }
 0x470   :  { %v870_v38 = vmul.f32 0.16666667, %v854_v46  ;;  %1198 = vmatmul.f32.gmra.mxu3 %v1947_v26 }
 0x471   :  { %1948 = vtanh.f32 %v1122_v21 }
 0x472   :  { %v886_v57 = vmul.f32 0.05, %v870_v38 }
 0x473   :  { %v747_v63 = vpop.f32.mrf.mxu3 }
 0x474   :  { %v902_v59 = vadd.f32 %v2924_v37, %v886_v57  ;;  %v748_v4 = vadd.f32 %v3008_v8, %v747_v63 }
 0x476   :  { %1726 = vst [vmem:[#allocation5 + $0x8] sm:$0xff] %v902_v59  ;;  %v855_v15 = vadd.f32 %v2948_v56, %v748_v4  ;;  %v1124_v36 = vpop.f32.mrf.mxu2 }
 0x477   :  { %v1949_v22 = vpop.eup %1948  ;;  %v1125_v40 = vadd.f32 %v2893_v34, %v1124_v36 }
 0x478   :  { %v871_v32 = vmul.f32 0.16666667, %v855_v15  ;;  %1201 = vmatmul.f32.gmra.mxu3 %v1949_v22 }
 0x479   :  { %1950 = vtanh.f32 %v1125_v40 }
 0x47a   :  { %v887_v52 = vmul.f32 0.05, %v871_v32 }
 0x47b   :  { %v750_v31 = vpop.f32.mrf.mxu3 }
 0x47c   :  { %v903_v62 = vadd.f32 %v2945_v39, %v887_v52  ;;  %v751_v46 = vadd.f32 %v3008_v8, %v750_v31 }
 0x47e   :  { %1727 = vst [vmem:[#allocation5 + $0x10] sm:$0xff] %v903_v62  ;;  %v856_v37 = vadd.f32 %v2969_v43, %v751_v46  ;;  %v1127_v27 = vpop.f32.mrf.mxu2 }
 0x47f   :  { %v1951_v26 = vpop.eup %1950  ;;  %v1128_v56 = vadd.f32 %v2893_v34, %v1127_v27 }
 0x480   :  { %v872_v21 = vmul.f32 0.16666667, %v856_v37  ;;  %1204 = vmatmul.f32.gmra.mxu3 %v1951_v26 }
 0x481   :  { %1952 = vtanh.f32 %v1128_v56 }
 0x482   :  { %v888_v38 = vmul.f32 0.05, %v872_v21 }
 0x483   :  { %v753_v57 = vpop.f32.mrf.mxu3 }
 0x484   :  { %v904_v63 = vadd.f32 %v2966_v58, %v888_v38  ;;  %v754_v59 = vadd.f32 %v3008_v8, %v753_v57 }
 0x486   :  { %1728 = vst [vmem:[#allocation5 + $0x18] sm:$0xff] %v904_v63  ;;  %v857_v39 = vadd.f32 %v2990_v51, %v754_v59  ;;  %v1130_v4 = vpop.f32.mrf.mxu2 }
 0x487   :  { %v1953_v15 = vpop.eup %1952  ;;  %v1131_v43 = vadd.f32 %v2893_v34, %v1130_v4 }
 0x488   :  { %v873_v36 = vmul.f32 0.16666667, %v857_v39  ;;  %1207 = vmatmul.f32.gmra.mxu3 %v1953_v15 }
 0x489   :  { %1954 = vtanh.f32 %v1131_v43 }
 0x48a   :  { %v889_v22 = vmul.f32 0.05, %v873_v36 }
 0x48b   :  { %v756_v40 = vpop.f32.mrf.mxu3 }
 0x48c   :  { %v905_v32 = vadd.f32 %v2987_v54, %v889_v22  ;;  %v757_v52 = vadd.f32 %v3008_v8, %v756_v40 }
 0x48e   :  { %1729 = vst [vmem:[#allocation5 + $0x20] sm:$0xff] %v905_v32  ;;  %v858_v58 = vadd.f32 %v3002_v6, %v757_v52  ;;  %v1133_v31 = vpop.f32.mrf.mxu2  ;;  %v3273_v6 = vld [vmem:[%s3612_s2] ss:$0 sm:$0xff] }
 0x48f   :  { %v1955_v62 = vpop.eup %1954  ;;  %v1134_v51 = vadd.f32 %v2893_v34, %v1133_v31 }
 0x490   :  { %v874_v46 = vmul.f32 0.16666667, %v858_v58  ;;  %1210 = vmatmul.f32.gmra.mxu3 %v1955_v62 }
 0x491   :  { %1956 = vtanh.f32 %v1134_v51 }
 0x492   :  { %v890_v37 = vmul.f32 0.05, %v874_v46 }
 0x493   :  { %v759_v27 = vpop.f32.mrf.mxu3 }
 0x494   :  { %v906_v26 = vadd.f32 %v2999_v45, %v890_v37  ;;  %v760_v56 = vadd.f32 %v3008_v8, %v759_v27 }
 0x496   :  { %1730 = vst [vmem:[#allocation5 + $0x28] sm:$0xff] %v906_v26  ;;  %v859_v54 = vadd.f32 %v3016_v47, %v760_v56  ;;  %v1136_v21 = vpop.f32.mrf.mxu2 }
 0x497   :  { %v1957_v38 = vpop.eup %1956  ;;  %v1137_v34 = vadd.f32 %v3273_v6, %v1136_v21 }
 0x498   :  { %v875_v57 = vmul.f32 0.16666667, %v859_v54  ;;  %1213 = vmatmul.f32.gmra.mxu3 %v1957_v38 }
 0x499   :  { %1958 = vtanh.f32 %v1137_v34 }
 0x49a   :  { %v891_v63 = vmul.f32 0.05, %v875_v57 }
 0x49b   :  { %v762_v59 = vpop.f32.mrf.mxu3 }
 0x49c   :  { %v907_v45 = vadd.f32 %v3013_v13, %v891_v63  ;;  %v763_v39 = vadd.f32 %v3008_v8, %v762_v59 }
 0x49e   :  { %1731 = vst [vmem:[#allocation5 + $0x30] sm:$0xff] %v907_v45  ;;  %v860_v47 = vadd.f32 %v3025_v11, %v763_v39  ;;  %v1139_v4 = vpop.f32.mrf.mxu2 }
 0x49f   :  { %v1959_v15 = vpop.eup %1958  ;;  %v1140_v43 = vadd.f32 %v3273_v6, %v1139_v4 }
 0x4a0   :  { %v876_v36 = vmul.f32 0.16666667, %v860_v47  ;;  %1216 = vmatmul.f32.gmra.mxu3 %v1959_v15 }
 0x4a1   :  { %1960 = vtanh.f32 %v1140_v43 }
 0x4a2   :  { %v892_v22 = vmul.f32 0.05, %v876_v36 }
 0x4a3   :  { %v765_v40 = vpop.f32.mrf.mxu3 }
 0x4a4   :  { %v908_v32 = vadd.f32 %v3022_v2, %v892_v22  ;;  %v766_v52 = vadd.f32 %v3008_v8, %v765_v40 }
 0x4a6   :  { %1732 = vst [vmem:[#allocation5 + $0x38] sm:$0xff] %v908_v32  ;;  %v861_v13 = vadd.f32 %v3034_v28, %v766_v52  ;;  %v1142_v58 = vpop.f32.mrf.mxu2 }
 0x4a7   :  { %v1961_v31 = vpop.eup %1960  ;;  %v1143_v11 = vadd.f32 %v3273_v6, %v1142_v58 }
 0x4a8   :  { %v877_v62 = vmul.f32 0.16666667, %v861_v13  ;;  %1219 = vmatmul.f32.gmra.mxu3 %v1961_v31 }
 0x4a9   :  { %1962 = vtanh.f32 %v1143_v11 }
 0x4aa   :  { %v893_v51 = vmul.f32 0.05, %v877_v62 }
 0x4ab   :  { %v768_v46 = vpop.f32.mrf.mxu3 }
 0x4ac   :  { %v909_v37 = vadd.f32 %v3031_v60, %v893_v51  ;;  %v769_v27 = vadd.f32 %v3008_v8, %v768_v46 }
 0x4ae   :  { %1733 = vst [vmem:[#allocation5 + $0x40] sm:$0xff] %v909_v37  ;;  %v862_v2 = vadd.f32 %v3043_v30, %v769_v27  ;;  %v1145_v26 = vpop.f32.mrf.mxu2 }
 0x4af   :  { %v1963_v56 = vpop.eup %1962  ;;  %v1146_v28 = vadd.f32 %v3273_v6, %v1145_v26 }
 0x4b0   :  { %v878_v54 = vmul.f32 0.16666667, %v862_v2  ;;  %1222 = vmatmul.f32.gmra.mxu3 %v1963_v56 }
 0x4b1   :  { %1964 = vtanh.f32 %v1146_v28 }
 0x4b2   :  { %v894_v21 = vmul.f32 0.05, %v878_v54 }
 0x4b3   :  { %v771_v38 = vpop.f32.mrf.mxu3 }
 0x4b4   :  { %v910_v34 = vadd.f32 %v3040_v20, %v894_v21  ;;  %v772_v57 = vadd.f32 %v3008_v8, %v771_v38 }
 0x4b6   :  { %1734 = vst [vmem:[#allocation5 + $0x48] sm:$0xff] %v910_v34  ;;  %v863_v60 = vadd.f32 %v3052_v29, %v772_v57  ;;  %v1148_v63 = vpop.f32.mrf.mxu2 }
 0x4b7   :  { %v1965_v59 = vpop.eup %1964  ;;  %v1149_v30 = vadd.f32 %v3273_v6, %v1148_v63 }
 0x4b8   :  { %v879_v45 = vmul.f32 0.16666667, %v863_v60  ;;  %1225 = vmatmul.f32.gmra.mxu3 %v1965_v59 }
 0x4b9   :  { %1966 = vtanh.f32 %v1149_v30 }
 0x4ba   :  { %v895_v39 = vmul.f32 0.05, %v879_v45 }
 0x4bb   :  { %v774_v47 = vpop.f32.mrf.mxu3 }
 0x4bc   :  { %v911_v4 = vadd.f32 %v3049_v50, %v895_v39  ;;  %v775_v15 = vadd.f32 %v3008_v8, %v774_v47 }
 0x4be   :  { %1735 = vst [vmem:[#allocation5 + $0x50] sm:$0xff] %v911_v4  ;;  %v864_v20 = vadd.f32 %v3061_v18, %v775_v15  ;;  %v1151_v43 = vpop.f32.mrf.mxu2  ;;  %v3315_v4 = vld [vmem:[#allocation2 + $0x80] sm:$0xff] }
 0x4bf   :  { %v1967_v36 = vpop.eup %1966  ;;  %v1152_v29 = vadd.f32 %v3273_v6, %v1151_v43  ;;  %v3322_v43 = vld [vmem:[#allocation2 + $0x88] sm:$0xff] }
 0x4c0   :  { %v880_v22 = vmul.f32 0.16666667, %v864_v20  ;;  %1228 = vmatmul.f32.gmra.mxu3 %v1967_v36 }
 0x4c1   :  { %1968 = vtanh.f32 %v1152_v29  ;;  %v3328_v29 = vld [vmem:[%s3614_s4] ss:$0 sm:$0xff]  ;;  %s2161_s4 = smov [#allocation5]  }
 0x4c2   :  { %v896_v40 = vmul.f32 0.05, %v880_v22  ;;  %s1761_s15 = sshll.u32 %s2161_s4, 4  ;;  %s1762_s15 = int_to_ptr.vmem [resolvable:$true] %s1761_s15 }
 0x4c3   :  { %v777_v32 = vpop.f32.mrf.mxu3 }
 0x4c4   :  { %v912_v52 = vadd.f32 %v3058_v12, %v896_v40  ;;  %v778_v13 = vadd.f32 %v3008_v8, %v777_v32 }
 0x4c6   :  { %1736 = vst [vmem:[#allocation5 + $0x58] sm:$0xff] %v912_v52  ;;  %v865_v50 = vadd.f32 %v3070_v42, %v778_v13  ;;  %v1154_v58 = vpop.f32.mrf.mxu2 }
 0x4c7   :  { %v1969_v31 = vpop.eup %1968  ;;  %v1155_v18 = vadd.f32 %v3273_v6, %v1154_v58  ;;  %v3341_v58 = vld [vmem:[#allocation2 + $0x98] sm:$0xff] }
 0x4c8   :  { %v881_v11 = vmul.f32 0.16666667, %v865_v50  ;;  %1231 = vmatmul.f32.gmra.mxu3 %v1969_v31 }
 0x4c9   :  { %1970 = vtanh.f32 %v1155_v18 }
 0x4ca   :  { %v897_v62 = vmul.f32 0.05, %v881_v11 }
 0x4cb   :  { %v780_v51 = vpop.f32.mrf.mxu3 }
 0x4cc   :  { %v913_v46 = vadd.f32 %v3067_v48, %v897_v62  ;;  %v781_v37 = vadd.f32 %v3008_v8, %v780_v51  ;;  %v3348_v51 = vld [vmem:[#allocation2 + $0xa0] sm:$0xff] }
 0x4ce   :  { %1737 = vst [vmem:[#allocation5 + $0x60] sm:$0xff] %v913_v46  ;;  %v866_v12 = vadd.f32 %v3079_v61, %v781_v37  ;;  %v1157_v27 = vpop.f32.mrf.mxu2 }
 0x4cf   :  { %v1971_v2 = vpop.eup %1970  ;;  %v1158_v42 = vadd.f32 %v3273_v6, %v1157_v27 }
 0x4d0   :  { %v882_v26 = vmul.f32 0.16666667, %v866_v12  ;;  %1234 = vmatmul.f32.gmra.mxu3 %v1971_v2  ;;  %v3355_v2 = vld [vmem:[#allocation2 + $0xa8] sm:$0xff] }
 0x4d1   :  { %1972 = vtanh.f32 %v1158_v42 }
 0x4d2   :  { %v898_v56 = vmul.f32 0.05, %v882_v26 }
 0x4d3   :  { %v783_v28 = vpop.f32.mrf.mxu3 }
 0x4d4   :  { %v914_v54 = vadd.f32 %v3076_v23, %v898_v56  ;;  %v784_v21 = vadd.f32 %v3008_v8, %v783_v28 }
 0x4d6   :  { %1738 = vst [vmem:[#allocation5 + $0x68] sm:$0xff] %v914_v54  ;;  %v867_v48 = vadd.f32 %v3088_v7, %v784_v21  ;;  %v3362_v54 = vld [vmem:[#allocation2 + $0xb0] sm:$0xff] }
 0x4d7   :  { %v1973_v38 = vpop.eup %1972 }
 0x4d8   :  { %v883_v34 = vmul.f32 0.16666667, %v867_v48  ;;  %1237 = vmatmul.f32.gmra.mxu3 %v1973_v38 }
 0x4da   :  { %v899_v61 = vmul.f32 0.05, %v883_v34 }
 0x4db   :  { %v786_v57 = vpop.f32.mrf.mxu3 }
 0x4dc   :  { %v915_v60 = vadd.f32 %v3085_v35, %v899_v61  ;;  %v787_v63 = vadd.f32 %v3008_v8, %v786_v57  ;;  %v3369_v61 = vld [vmem:[#allocation2 + $0xb8] sm:$0xff] }
 0x4de   :  { %1739 = vst [vmem:[#allocation5 + $0x70] sm:$0xff] %v915_v60  ;;  %v868_v59 = vadd.f32 %v3096_v5, %v787_v63 }
 0x4e0   :  { %v884_v30 = vmul.f32 0.16666667, %v868_v59 }
 0x4e2   :  { %v900_v45 = vmul.f32 0.05, %v884_v30  ;;  %v3376_v30 = vld [vmem:[#allocation2 + $0xc0] sm:$0xff] }
 0x4e3   :  { %v1193_v23 = vpop.f32.mrf.mxu3 }
 0x4e4   :  { %v916_v39 = vadd.f32 %v3093_v3, %v900_v45  ;;  %v3312_v47 = vadd.f32 %v3008_v8, %v1193_v23 }
 0x4e6   :  { %1740 = vst [vmem:[#allocation5 + $0x78] sm:$0xff] %v916_v39  ;;  %v1241_v7 = vmul.f32 0.025, %v3312_v47 }
 0x4e8   :  { %v1257_v35 = vadd.f32 %v3315_v4, %v1241_v7 }
 0x4ea   :  { %1289 = vmatmul.f32.vlgmr.msrb.gmra.mxu0 %v1257_v35  ;;  %v3383_v35 = vld [vmem:[#allocation2 + $0xc8] sm:$0xff] }
 0x4eb   :  { %v1196_v15 = vpop.f32.mrf.mxu3 }
 0x4ec   :  { %v3319_v20 = vadd.f32 %v3008_v8, %v1196_v15  ;;  %v3334_v8 = vld [vmem:[#allocation2 + $0x90] sm:$0xff] }
 0x4ee   :  { %v1242_v5 = vmul.f32 0.025, %v3319_v20 }
 0x4f0   :  { %v1258_v3 = vadd.f32 %v3322_v43, %v1242_v5 }
 0x4f2   :  { %1292 = vmatmul.f32.gmra.mxu0 %v1258_v3 }
 0x4f3   :  { %v1199_v36 = vpop.f32.mrf.mxu3 }
 0x4f4   :  { %v3331_v22 = vadd.f32 %v3328_v29, %v1199_v36 }
 0x4f6   :  { %v1243_v40 = vmul.f32 0.025, %v3331_v22 }
 0x4f8   :  { %v1259_v32 = vadd.f32 %v3334_v8, %v1243_v40  ;;  %v3390_v40 = vld [vmem:[#allocation2 + $0xd0] sm:$0xff] }
 0x4fa   :  { %1295 = vmatmul.f32.gmra.mxu0 %v1259_v32 }
 0x4fb   :  { %v1202_v52 = vpop.f32.mrf.mxu3 }
 0x4fc   :  { %v3338_v13 = vadd.f32 %v3328_v29, %v1202_v52 }
 0x4fe   :  { %v1244_v50 = vmul.f32 0.025, %v3338_v13 }
 0x500   :  { %v1260_v31 = vadd.f32 %v3341_v58, %v1244_v50 }
 0x502   :  { %1298 = vmatmul.f32.gmra.mxu0 %v1260_v31 }
 0x503   :  { %v1205_v18 = vpop.f32.mrf.mxu3 }
 0x504   :  { %v3345_v11 = vadd.f32 %v3328_v29, %v1205_v18  ;;  %v3397_v18 = vld [vmem:[#allocation2 + $0xd8] sm:$0xff] }
 0x506   :  { %v1245_v62 = vmul.f32 0.025, %v3345_v11 }
 0x508   :  { %v1261_v46 = vadd.f32 %v3348_v51, %v1245_v62 }
 0x50a   :  { %1301 = vmatmul.f32.gmra.mxu0 %v1261_v46 }
 0x50b   :  { %v1208_v37 = vpop.f32.mrf.mxu3 }
 0x50c   :  { %v3352_v12 = vadd.f32 %v3328_v29, %v1208_v37 }
 0x50e   :  { %v1246_v27 = vmul.f32 0.025, %v3352_v12 }
 0x510   :  { %v1262_v42 = vadd.f32 %v3355_v2, %v1246_v27 }
 0x512   :  { %1304 = vmatmul.f32.gmra.mxu0 %v1262_v42  ;;  %v3404_v42 = vld [vmem:[#allocation2 + $0xe0] sm:$0xff] }
 0x513   :  { %v1211_v26 = vpop.f32.mrf.mxu3 }
 0x514   :  { %v3359_v56 = vadd.f32 %v3328_v29, %v1211_v26 }
 0x516   :  { %v1247_v28 = vmul.f32 0.025, %v3359_v56 }
 0x518   :  { %v1263_v21 = vadd.f32 %v3362_v54, %v1247_v28 }
 0x51a   :  { %1307 = vmatmul.f32.gmra.mxu0 %v1263_v21 }
 0x51b   :  { %v1214_v48 = vpop.f32.mrf.mxu3 }
 0x51c   :  { %v3366_v38 = vadd.f32 %v3328_v29, %v1214_v48 }
 0x51e   :  { %v1248_v34 = vmul.f32 0.025, %v3366_v38 }
 0x520   :  { %v1264_v57 = vadd.f32 %v3369_v61, %v1248_v34  ;;  %v3411_v34 = vld [vmem:[#allocation2 + $0xe8] sm:$0xff] }
 0x522   :  { %1310 = vmatmul.f32.gmra.mxu0 %v1264_v57 }
 0x523   :  { %v1217_v60 = vpop.f32.mrf.mxu3 }
 0x524   :  { %v3373_v63 = vadd.f32 %v3328_v29, %v1217_v60 }
 0x526   :  { %v1249_v59 = vmul.f32 0.025, %v3373_v63 }
 0x528   :  { %v1265_v45 = vadd.f32 %v3376_v30, %v1249_v59 }
 0x52a   :  { %1313 = vmatmul.f32.gmra.mxu0 %v1265_v45 }
 0x52b   :  { %v1220_v23 = vpop.f32.mrf.mxu3 }
 0x52c   :  { %v3380_v39 = vadd.f32 %v3328_v29, %v1220_v23  ;;  %v3418_v23 = vld [vmem:[#allocation2 + $0xf0] sm:$0xff] }
 0x52e   :  { %v1250_v7 = vmul.f32 0.025, %v3380_v39 }
 0x530   :  { %v1266_v15 = vadd.f32 %v3383_v35, %v1250_v7 }
 0x532   :  { %1316 = vmatmul.f32.gmra.mxu0 %v1266_v15 }
 0x533   :  { %v1223_v5 = vpop.f32.mrf.mxu3 }
 0x534   :  { %v3387_v3 = vadd.f32 %v3328_v29, %v1223_v5 }
 0x536   :  { %v1251_v36 = vmul.f32 0.025, %v3387_v3 }
 0x538   :  { %v1267_v32 = vadd.f32 %v3390_v40, %v1251_v36 }
 0x53a   :  { %1319 = vmatmul.f32.gmra.mxu0 %v1267_v32  ;;  %v3425_v32 = vld [vmem:[#allocation2 + $0xf8] sm:$0xff] }
 0x53b   :  { %v1226_v52 = vpop.f32.mrf.mxu3 }
 0x53c   :  { %v3394_v50 = vadd.f32 %v3328_v29, %v1226_v52 }
 0x53e   :  { %v1252_v31 = vmul.f32 0.025, %v3394_v50 }
 0x540   :  { %v1268_v62 = vadd.f32 %v3397_v18, %v1252_v31 }
 0x542   :  { %1322 = vmatmul.f32.gmra.mxu0 %v1268_v62 }
 0x543   :  { %v1229_v46 = vpop.f32.mrf.mxu3 }
 0x544   :  { %v3401_v37 = vadd.f32 %v3328_v29, %v1229_v46 }
 0x546   :  { %v1253_v27 = vmul.f32 0.025, %v3401_v37 }
 0x548   :  { %v1269_v26 = vadd.f32 %v3404_v42, %v1253_v27 }
 0x54a   :  { %1325 = vmatmul.f32.gmra.mxu0 %v1269_v26 }
 0x54b   :  { %v1232_v28 = vpop.f32.mrf.mxu3 }
 0x54c   :  { %v3408_v21 = vadd.f32 %v3328_v29, %v1232_v28 }
 0x54e   :  { %v1254_v48 = vmul.f32 0.025, %v3408_v21 }
 0x550   :  { %v1270_v57 = vadd.f32 %v3411_v34, %v1254_v48 }
 0x552   :  { %1328 = vmatmul.f32.gmra.mxu0 %v1270_v57 }
 0x553   :  { %v1235_v60 = vpop.f32.mrf.mxu3 }
 0x554   :  { %v3415_v59 = vadd.f32 %v3328_v29, %v1235_v60 }
 0x556   :  { %v1255_v45 = vmul.f32 0.025, %v3415_v59 }
 0x558   :  { %v1271_v7 = vadd.f32 %v3418_v23, %v1255_v45 }
 0x55a   :  { %1331 = vmatmul.f32.gmra.mxu0 %v1271_v7 }
 0x55b   :  { %v1238_v15 = vpop.f32.mrf.mxu3 }
 0x55c   :  { %v3422_v5 = vadd.f32 %v3328_v29, %v1238_v15 }
 0x55e   :  { %v1256_v36 = vmul.f32 0.025, %v3422_v5 }
 0x560   :  { %v1272_v52 = vadd.f32 %v3425_v32, %v1256_v36 }
 0x562   :  { %1334 = vmatmul.f32.gmra.mxu0 %v1272_v52 }
 0x567   :  { %v1290_v31 = vpop.f32.mrf.mxu0 }
 0x568   :  { %v1291_v62 = vadd.f32 %v3273_v6, %v1290_v31 }
 0x56a   :  { %1974 = vtanh.f32 %v1291_v62 }
 0x56f   :  { %v1293_v46 = vpop.f32.mrf.mxu0 }
 0x570   :  { %v1975_v27 = vpop.eup %1974  ;;  %v1294_v26 = vadd.f32 %v3273_v6, %v1293_v46 }
 0x571   :  { %1370 = vmatmul.f32.vlgmr.msrb.gmra.mxu1 %v1975_v27 }
 0x572   :  { %1976 = vtanh.f32 %v1294_v26 }
 0x577   :  { %v1296_v28 = vpop.f32.mrf.mxu0 }
 0x578   :  { %v1977_v48 = vpop.eup %1976  ;;  %v1297_v57 = vadd.f32 %v3273_v6, %v1296_v28 }
 0x579   :  { %1373 = vmatmul.f32.gmra.mxu1 %v1977_v48 }
 0x57a   :  { %1978 = vtanh.f32 %v1297_v57 }
 0x57f   :  { %v1299_v60 = vpop.f32.mrf.mxu0 }
 0x580   :  { %v1979_v45 = vpop.eup %1978  ;;  %v1300_v7 = vadd.f32 %v3273_v6, %v1299_v60 }
 0x581   :  { %1376 = vmatmul.f32.gmra.mxu1 %v1979_v45 }
 0x582   :  { %1980 = vtanh.f32 %v1300_v7 }
 0x587   :  { %v1302_v15 = vpop.f32.mrf.mxu0 }
 0x588   :  { %v1981_v36 = vpop.eup %1980  ;;  %v1303_v52 = vadd.f32 %v3273_v6, %v1302_v15 }
 0x589   :  { %1379 = vmatmul.f32.gmra.mxu1 %v1981_v36 }
 0x58a   :  { %1982 = vtanh.f32 %v1303_v52 }
 0x58f   :  { %v1305_v31 = vpop.f32.mrf.mxu0 }
 0x590   :  { %v1983_v62 = vpop.eup %1982  ;;  %v1306_v46 = vadd.f32 %v3273_v6, %v1305_v31 }
 0x591   :  { %1382 = vmatmul.f32.gmra.mxu1 %v1983_v62 }
 0x592   :  { %1984 = vtanh.f32 %v1306_v46 }
 0x597   :  { %v1308_v27 = vpop.f32.mrf.mxu0 }
 0x598   :  { %v1985_v26 = vpop.eup %1984  ;;  %v1309_v28 = vadd.f32 %v3273_v6, %v1308_v27 }
 0x599   :  { %1385 = vmatmul.f32.gmra.mxu1 %v1985_v26 }
 0x59a   :  { %1986 = vtanh.f32 %v1309_v28 }
 0x59f   :  { %v1311_v48 = vpop.f32.mrf.mxu0 }
 0x5a0   :  { %v1987_v57 = vpop.eup %1986  ;;  %v1312_v60 = vadd.f32 %v3273_v6, %v1311_v48 }
 0x5a1   :  { %1388 = vmatmul.f32.gmra.mxu1 %v1987_v57 }
 0x5a2   :  { %1988 = vtanh.f32 %v1312_v60 }
 0x5a7   :  { %v1314_v45 = vpop.f32.mrf.mxu0 }
 0x5a8   :  { %v1989_v7 = vpop.eup %1988  ;;  %v1315_v15 = vadd.f32 %v3273_v6, %v1314_v45 }
 0x5a9   :  { %1391 = vmatmul.f32.gmra.mxu1 %v1989_v7 }
 0x5aa   :  { %1990 = vtanh.f32 %v1315_v15 }
 0x5af   :  { %v1317_v36 = vpop.f32.mrf.mxu0 }
 0x5b0   :  { %v1991_v52 = vpop.eup %1990  ;;  %v1318_v31 = vadd.f32 %v3273_v6, %v1317_v36 }
 0x5b1   :  { %1394 = vmatmul.f32.gmra.mxu1 %v1991_v52 }
 0x5b2   :  { %1992 = vtanh.f32 %v1318_v31 }
 0x5b7   :  { %v1320_v62 = vpop.f32.mrf.mxu0 }
 0x5b8   :  { %v1993_v46 = vpop.eup %1992  ;;  %v1321_v27 = vadd.f32 %v3273_v6, %v1320_v62 }
 0x5b9   :  { %1397 = vmatmul.f32.gmra.mxu1 %v1993_v46 }
 0x5ba   :  { %1994 = vtanh.f32 %v1321_v27 }
 0x5bf   :  { %v1323_v26 = vpop.f32.mrf.mxu0 }
 0x5c0   :  { %v1995_v28 = vpop.eup %1994  ;;  %v1324_v48 = vadd.f32 %v3273_v6, %v1323_v26 }
 0x5c1   :  { %1400 = vmatmul.f32.gmra.mxu1 %v1995_v28 }
 0x5c2   :  { %1996 = vtanh.f32 %v1324_v48  ;;  %v1597_v48 = vmul.f32 2.0, %v3312_v47 }
 0x5c7   :  { %v1326_v57 = vpop.f32.mrf.mxu0 }
 0x5c8   :  { %v1997_v60 = vpop.eup %1996  ;;  %v1327_v45 = vadd.f32 %v3273_v6, %v1326_v57 }
 0x5c9   :  { %1403 = vmatmul.f32.gmra.mxu1 %v1997_v60 }
 0x5ca   :  { %1998 = vtanh.f32 %v1327_v45  ;;  %v1613_v45 = vadd.f32 %v1597_v48, %v3099_v19  ;;  %v1599_v19 = vmul.f32 2.0, %v3331_v22 }
 0x5cf   :  { %v1329_v7 = vpop.f32.mrf.mxu0 }
 0x5d0   :  { %v1999_v15 = vpop.eup %1998  ;;  %v1330_v36 = vadd.f32 %v3273_v6, %v1329_v7 }
 0x5d1   :  { %1406 = vmatmul.f32.gmra.mxu1 %v1999_v15 }
 0x5d2   :  { %2000 = vtanh.f32 %v1330_v36 }
 0x5d7   :  { %v1332_v52 = vpop.f32.mrf.mxu0 }
 0x5d8   :  { %v2001_v31 = vpop.eup %2000  ;;  %v1333_v62 = vadd.f32 %v3273_v6, %v1332_v52 }
 0x5d9   :  { %1409 = vmatmul.f32.gmra.mxu1 %v2001_v31  ;;  %v1598_v31 = vmul.f32 2.0, %v3319_v20  ;;  %v1615_v20 = vadd.f32 %v1599_v19, %v3110_v9  ;;  %v1601_v9 = vmul.f32 2.0, %v3345_v11 }
 0x5da   :  { %2002 = vtanh.f32 %v1333_v62 }
 0x5df   :  { %v1335_v46 = vpop.f32.mrf.mxu0 }
 0x5e0   :  { %v2003_v27 = vpop.eup %2002  ;;  %v1336_v26 = vadd.f32 %v3273_v6, %v1335_v46 }
 0x5e1   :  { %1412 = vmatmul.f32.gmra.mxu1 %v2003_v27  ;;  %v1614_v27 = vadd.f32 %v1598_v31, %v3104_v17  ;;  %v1600_v17 = vmul.f32 2.0, %v3338_v13  ;;  %v1617_v13 = vadd.f32 %v1601_v9, %v3140_v16  ;;  %v1603_v16 = vmul.f32 2.0, %v3359_v56 }
 0x5e2   :  { %2004 = vtanh.f32 %v1336_v26 }
 0x5e3   :  { %v1616_v22 = vadd.f32 %v1600_v17, %v3122_v49  ;;  %v1602_v49 = vmul.f32 2.0, %v3352_v12  ;;  %v1619_v12 = vadd.f32 %v1603_v16, %v3176_v33  ;;  %v1605_v33 = vmul.f32 2.0, %v3373_v63 }
 0x5e5   :  { %v1618_v11 = vadd.f32 %v1602_v49, %v3158_v41  ;;  %v1604_v41 = vmul.f32 2.0, %v3366_v38  ;;  %v1621_v38 = vadd.f32 %v1605_v33, %v3194_v53  ;;  %v1607_v53 = vmul.f32 2.0, %v3387_v3 }
 0x5e7   :  { %v1620_v56 = vadd.f32 %v1604_v41, %v3188_v1  ;;  %v1606_v1 = vmul.f32 2.0, %v3380_v39  ;;  %v1623_v39 = vadd.f32 %v1607_v53, %v3206_v0  ;;  %v1609_v0 = vmul.f32 2.0, %v3401_v37 }
 0x5e8   :  { %v2005_v28 = vpop.eup %2004 }
 0x5e9   :  { %1415 = vmatmul.f32.gmra.mxu1 %v2005_v28  ;;  %v1622_v63 = vadd.f32 %v1606_v1, %v3200_v55  ;;  %v1608_v55 = vmul.f32 2.0, %v3394_v50  ;;  %v1625_v50 = vadd.f32 %v1609_v0, %v3218_v25  ;;  %v1611_v25 = vmul.f32 2.0, %v3415_v59 }
 0x5eb   :  { %v1624_v3 = vadd.f32 %v1608_v55, %v3212_v24  ;;  %v1610_v24 = vmul.f32 2.0, %v3408_v21  ;;  %v1627_v21 = vadd.f32 %v1611_v25, %v3230_v14 }
 0x5ed   :  { %v1626_v37 = vadd.f32 %v1610_v24, %v3224_v10  ;;  %v1612_v10 = vmul.f32 2.0, %v3422_v5 }
 0x5ee   :  { %v1371_v57 = vpop.f32.mrf.mxu1 }
 0x5ef   :  { %v1372_v60 = vadd.f32 %v3328_v29, %v1371_v57  ;;  %v1628_v59 = vadd.f32 %v1612_v10, %v3236_v44 }
 0x5f1   :  { %v1419_v7 = vmul.f32 0.025, %v1372_v60  ;;  %v1629_v15 = vmul.f32 2.0, %v1372_v60 }
 0x5f3   :  { %v1435_v36 = vadd.f32 %v3315_v4, %v1419_v7  ;;  %v3448_v52 = vadd.f32 %v1629_v15, %v1613_v45 }
 0x5f5   :  { %1467 = vmatmul.f32.vlgmr.msrb.gmra.mxu2 %v1435_v36 }
 0x5f6   :  { %v1374_v62 = vpop.f32.mrf.mxu1 }
 0x5f7   :  { %v1375_v46 = vadd.f32 %v3328_v29, %v1374_v62 }
 0x5f9   :  { %v1420_v47 = vmul.f32 0.025, %v1375_v46  ;;  %v1630_v26 = vmul.f32 2.0, %v1375_v46 }
 0x5fb   :  { %v1436_v28 = vadd.f32 %v3322_v43, %v1420_v47  ;;  %v3454_v57 = vadd.f32 %v1630_v26, %v1614_v27 }
 0x5fd   :  { %1470 = vmatmul.f32.gmra.mxu2 %v1436_v28 }
 0x5fe   :  { %v1377_v48 = vpop.f32.mrf.mxu1 }
 0x5ff   :  { %v1378_v60 = vadd.f32 %v3328_v29, %v1377_v48 }
 0x601   :  { %v1421_v45 = vmul.f32 0.025, %v1378_v60  ;;  %v1631_v7 = vmul.f32 2.0, %v1378_v60 }
 0x603   :  { %v1437_v15 = vadd.f32 %v3334_v8, %v1421_v45  ;;  %v3460_v36 = vadd.f32 %v1631_v7, %v1615_v20 }
 0x605   :  { %1473 = vmatmul.f32.gmra.mxu2 %v1437_v15 }
 0x606   :  { %v1380_v31 = vpop.f32.mrf.mxu1 }
 0x607   :  { %v1381_v62 = vadd.f32 %v3328_v29, %v1380_v31 }
 0x609   :  { %v1422_v46 = vmul.f32 0.025, %v1381_v62  ;;  %v1632_v27 = vmul.f32 2.0, %v1381_v62 }
 0x60b   :  { %v1438_v47 = vadd.f32 %v3341_v58, %v1422_v46  ;;  %v3466_v26 = vadd.f32 %v1632_v27, %v1616_v22 }
 0x60d   :  { %1476 = vmatmul.f32.gmra.mxu2 %v1438_v47 }
 0x60e   :  { %v1383_v28 = vpop.f32.mrf.mxu1 }
 0x60f   :  { %v1384_v19 = vadd.f32 %v3328_v29, %v1383_v28 }
 0x611   :  { %v1423_v48 = vmul.f32 0.025, %v1384_v19  ;;  %v1633_v60 = vmul.f32 2.0, %v1384_v19 }
 0x613   :  { %v1439_v20 = vadd.f32 %v3348_v51, %v1423_v48  ;;  %v3472_v45 = vadd.f32 %v1633_v60, %v1617_v13 }
 0x615   :  { %1479 = vmatmul.f32.gmra.mxu2 %v1439_v20 }
 0x616   :  { %v1386_v7 = vpop.f32.mrf.mxu1 }
 0x617   :  { %v1387_v15 = vadd.f32 %v3328_v29, %v1386_v7 }
 0x619   :  { %v1424_v17 = vmul.f32 0.025, %v1387_v15  ;;  %v1634_v31 = vmul.f32 2.0, %v1387_v15 }
 0x61b   :  { %v1440_v62 = vadd.f32 %v3355_v2, %v1424_v17  ;;  %v3478_v22 = vadd.f32 %v1634_v31, %v1618_v11 }
 0x61d   :  { %1482 = vmatmul.f32.gmra.mxu2 %v1440_v62 }
 0x61e   :  { %v1389_v46 = vpop.f32.mrf.mxu1 }
 0x61f   :  { %v1390_v27 = vadd.f32 %v3328_v29, %v1389_v46 }
 0x621   :  { %v1425_v47 = vmul.f32 0.025, %v1390_v27  ;;  %v1635_v9 = vmul.f32 2.0, %v1390_v27 }
 0x623   :  { %v1441_v28 = vadd.f32 %v3362_v54, %v1425_v47  ;;  %v3484_v19 = vadd.f32 %v1635_v9, %v1619_v12 }
 0x625   :  { %1485 = vmatmul.f32.gmra.mxu2 %v1441_v28 }
 0x626   :  { %v1392_v13 = vpop.f32.mrf.mxu1 }
 0x627   :  { %v1393_v48 = vadd.f32 %v3328_v29, %v1392_v13 }
 0x629   :  { %v1426_v60 = vmul.f32 0.025, %v1393_v48  ;;  %v1636_v20 = vmul.f32 2.0, %v1393_v48 }
 0x62b   :  { %v1442_v49 = vadd.f32 %v3369_v61, %v1426_v60  ;;  %v3490_v7 = vadd.f32 %v1636_v20, %v1620_v56 }
 0x62d   :  { %1488 = vmatmul.f32.gmra.mxu2 %v1442_v49 }
 0x62e   :  { %v1395_v15 = vpop.f32.mrf.mxu1 }
 0x62f   :  { %v1396_v11 = vadd.f32 %v3328_v29, %v1395_v15 }
 0x631   :  { %v1427_v17 = vmul.f32 0.025, %v1396_v11  ;;  %v1637_v31 = vmul.f32 2.0, %v1396_v11 }
 0x633   :  { %v1443_v62 = vadd.f32 %v3376_v30, %v1427_v17  ;;  %v3496_v16 = vadd.f32 %v1637_v31, %v1621_v38 }
 0x635   :  { %1491 = vmatmul.f32.gmra.mxu2 %v1443_v62 }
 0x636   :  { %v1398_v46 = vpop.f32.mrf.mxu1 }
 0x637   :  { %v1399_v27 = vadd.f32 %v3328_v29, %v1398_v46 }
 0x639   :  { %v1428_v12 = vmul.f32 0.025, %v1399_v27  ;;  %v1638_v47 = vmul.f32 2.0, %v1399_v27 }
 0x63b   :  { %v1444_v9 = vadd.f32 %v3383_v35, %v1428_v12  ;;  %v3502_v28 = vadd.f32 %v1638_v47, %v1622_v63 }
 0x63d   :  { %1494 = vmatmul.f32.gmra.mxu2 %v1444_v9 }
 0x63e   :  { %v1401_v41 = vpop.f32.mrf.mxu1 }
 0x63f   :  { %v1402_v13 = vadd.f32 %v3328_v29, %v1401_v41 }
 0x641   :  { %v1429_v48 = vmul.f32 0.025, %v1402_v13  ;;  %v1639_v56 = vmul.f32 2.0, %v1402_v13 }
 0x643   :  { %v1445_v60 = vadd.f32 %v3390_v40, %v1429_v48  ;;  %v3508_v20 = vadd.f32 %v1639_v56, %v1623_v39 }
 0x645   :  { %1497 = vmatmul.f32.gmra.mxu2 %v1445_v60 }
 0x646   :  { %v1404_v49 = vpop.f32.mrf.mxu1 }
 0x647   :  { %v1405_v33 = vadd.f32 %v3328_v29, %v1404_v49 }
 0x649   :  { %v1430_v15 = vmul.f32 0.025, %v1405_v33  ;;  %v1640_v11 = vmul.f32 2.0, %v1405_v33 }
 0x64b   :  { %v1446_v38 = vadd.f32 %v3397_v18, %v1430_v15  ;;  %v3514_v17 = vadd.f32 %v1640_v11, %v1624_v3 }
 0x64d   :  { %1500 = vmatmul.f32.gmra.mxu2 %v1446_v38 }
 0x64e   :  { %v1407_v31 = vpop.f32.mrf.mxu1 }
 0x64f   :  { %v1408_v62 = vadd.f32 %v3328_v29, %v1407_v31 }
 0x651   :  { %v1431_v1 = vmul.f32 0.025, %v1408_v62  ;;  %v1641_v46 = vmul.f32 2.0, %v1408_v62 }
 0x653   :  { %v1447_v27 = vadd.f32 %v3404_v42, %v1431_v1  ;;  %v3520_v63 = vadd.f32 %v1641_v46, %v1625_v50 }
 0x655   :  { %1503 = vmatmul.f32.gmra.mxu2 %v1447_v27 }
 0x656   :  { %v1410_v12 = vpop.f32.mrf.mxu1 }
 0x657   :  { %v1411_v47 = vadd.f32 %v3328_v29, %v1410_v12 }
 0x659   :  { %v1432_v9 = vmul.f32 0.025, %v1411_v47  ;;  %v1642_v53 = vmul.f32 2.0, %v1411_v47 }
 0x65b   :  { %v1448_v41 = vadd.f32 %v3411_v34, %v1432_v9  ;;  %v3526_v13 = vadd.f32 %v1642_v53, %v1626_v37 }
 0x65d   :  { %1506 = vmatmul.f32.gmra.mxu2 %v1448_v41 }
 0x65e   :  { %v1413_v39 = vpop.f32.mrf.mxu1 }
 0x65f   :  { %v1414_v48 = vadd.f32 %v3328_v29, %v1413_v39 }
 0x661   :  { %v1433_v56 = vmul.f32 0.025, %v1414_v48  ;;  %v1643_v60 = vmul.f32 2.0, %v1414_v48 }
 0x663   :  { %v1449_v55 = vadd.f32 %v3418_v23, %v1433_v56  ;;  %v3532_v49 = vadd.f32 %v1643_v60, %v1627_v21 }
 0x665   :  { %1509 = vmatmul.f32.gmra.mxu2 %v1449_v55 }
 0x666   :  { %v1416_v33 = vpop.f32.mrf.mxu1 }
 0x667   :  { %v1417_v3 = vadd.f32 %v3328_v29, %v1416_v33 }
 0x669   :  { %v1434_v15 = vmul.f32 0.025, %v1417_v3  ;;  %v1644_v11 = vmul.f32 2.0, %v1417_v3 }
 0x66b   :  { %v1450_v38 = vadd.f32 %v3425_v32, %v1434_v15  ;;  %v3538_v0 = vadd.f32 %v1644_v11, %v1628_v59 }
 0x66d   :  { %1512 = vmatmul.f32.gmra.mxu2 %v1450_v38 }
 0x678   :  { %v1468_v14 = vpop.f32.mrf.mxu2 }
 0x679   :  { %v1469_v31 = vadd.f32 %v3273_v6, %v1468_v14 }
 0x67b   :  { %2006 = vtanh.f32 %v1469_v31 }
 0x680   :  { %v1471_v62 = vpop.f32.mrf.mxu2 }
 0x681   :  { %v2007_v50 = vpop.eup %2006  ;;  %v1472_v5 = vadd.f32 %v3273_v6, %v1471_v62 }
 0x682   :  { %1548 = vmatmul.f32.vlgmr.msrb.gmra.mxu3 %v2007_v50 }
 0x683   :  { %2008 = vtanh.f32 %v1472_v5 }
 0x688   :  { %v1474_v1 = vpop.f32.mrf.mxu2 }
 0x689   :  { %v2009_v46 = vpop.eup %2008  ;;  %v1475_v44 = vadd.f32 %v3273_v6, %v1474_v1 }
 0x68a   :  { %1551 = vmatmul.f32.gmra.mxu3 %v2009_v46 }
 0x68b   :  { %2010 = vtanh.f32 %v1475_v44 }
 0x690   :  { %v1477_v27 = vpop.f32.mrf.mxu2 }
 0x691   :  { %v2011_v24 = vpop.eup %2010  ;;  %v1478_v12 = vadd.f32 %v3273_v6, %v1477_v27 }
 0x692   :  { %1554 = vmatmul.f32.gmra.mxu3 %v2011_v24 }
 0x693   :  { %2012 = vtanh.f32 %v1478_v12 }
 0x698   :  { %v1480_v47 = vpop.f32.mrf.mxu2 }
 0x699   :  { %v2013_v37 = vpop.eup %2012  ;;  %v1481_v9 = vadd.f32 %v3273_v6, %v1480_v47 }
 0x69a   :  { %1557 = vmatmul.f32.gmra.mxu3 %v2013_v37 }
 0x69b   :  { %2014 = vtanh.f32 %v1481_v9 }
 0x6a0   :  { %v1483_v53 = vpop.f32.mrf.mxu2 }
 0x6a1   :  { %v2015_v41 = vpop.eup %2014  ;;  %v1484_v25 = vadd.f32 %v3273_v6, %v1483_v53 }
 0x6a2   :  { %1560 = vmatmul.f32.gmra.mxu3 %v2015_v41 }
 0x6a3   :  { %2016 = vtanh.f32 %v1484_v25 }
 0x6a8   :  { %v1486_v39 = vpop.f32.mrf.mxu2 }
 0x6a9   :  { %v2017_v48 = vpop.eup %2016  ;;  %v1487_v21 = vadd.f32 %v3273_v6, %v1486_v39 }
 0x6aa   :  { %1563 = vmatmul.f32.gmra.mxu3 %v2017_v48 }
 0x6ab   :  { %2018 = vtanh.f32 %v1487_v21 }
 0x6b0   :  { %v1489_v56 = vpop.f32.mrf.mxu2 }
 0x6b1   :  { %v2019_v60 = vpop.eup %2018  ;;  %v1490_v55 = vadd.f32 %v3273_v6, %v1489_v56 }
 0x6b2   :  { %1566 = vmatmul.f32.gmra.mxu3 %v2019_v60 }
 0x6b3   :  { %2020 = vtanh.f32 %v1490_v55 }
 0x6b8   :  { %v1492_v10 = vpop.f32.mrf.mxu2 }
 0x6b9   :  { %v2021_v33 = vpop.eup %2020  ;;  %v1493_v3 = vadd.f32 %v3273_v6, %v1492_v10 }
 0x6ba   :  { %1569 = vmatmul.f32.gmra.mxu3 %v2021_v33 }
 0x6bb   :  { %2022 = vtanh.f32 %v1493_v3 }
 0x6c0   :  { %v1495_v59 = vpop.f32.mrf.mxu2 }
 0x6c1   :  { %v2023_v15 = vpop.eup %2022  ;;  %v1496_v11 = vadd.f32 %v3273_v6, %v1495_v59 }
 0x6c2   :  { %1572 = vmatmul.f32.gmra.mxu3 %v2023_v15 }
 0x6c3   :  { %2024 = vtanh.f32 %v1496_v11 }
 0x6c8   :  { %v1498_v38 = vpop.f32.mrf.mxu2 }
 0x6c9   :  { %v2025_v14 = vpop.eup %2024  ;;  %v1499_v31 = vadd.f32 %v3273_v6, %v1498_v38 }
 0x6ca   :  { %1575 = vmatmul.f32.gmra.mxu3 %v2025_v14 }
 0x6cb   :  { %2026 = vtanh.f32 %v1499_v31 }
 0x6d0   :  { %v1501_v62 = vpop.f32.mrf.mxu2 }
 0x6d1   :  { %v2027_v50 = vpop.eup %2026  ;;  %v1502_v5 = vadd.f32 %v3273_v6, %v1501_v62 }
 0x6d2   :  { %1578 = vmatmul.f32.gmra.mxu3 %v2027_v50 }
 0x6d3   :  { %2028 = vtanh.f32 %v1502_v5 }
 0x6d8   :  { %v1504_v1 = vpop.f32.mrf.mxu2 }
 0x6d9   :  { %v2029_v46 = vpop.eup %2028  ;;  %v1505_v44 = vadd.f32 %v3273_v6, %v1504_v1 }
 0x6da   :  { %1581 = vmatmul.f32.gmra.mxu3 %v2029_v46 }
 0x6db   :  { %2030 = vtanh.f32 %v1505_v44 }
 0x6e0   :  { %v1507_v27 = vpop.f32.mrf.mxu2 }
 0x6e1   :  { %v2031_v24 = vpop.eup %2030  ;;  %v1508_v12 = vadd.f32 %v3273_v6, %v1507_v27 }
 0x6e2   :  { %1584 = vmatmul.f32.gmra.mxu3 %v2031_v24 }
 0x6e3   :  { %2032 = vtanh.f32 %v1508_v12 }
 0x6e8   :  { %v1510_v47 = vpop.f32.mrf.mxu2 }
 0x6e9   :  { %v2033_v37 = vpop.eup %2032  ;;  %v1511_v9 = vadd.f32 %v3273_v6, %v1510_v47 }
 0x6ea   :  { %1587 = vmatmul.f32.gmra.mxu3 %v2033_v37 }
 0x6eb   :  { %2034 = vtanh.f32 %v1511_v9 }
 0x6f0   :  { %v1513_v53 = vpop.f32.mrf.mxu2 }
 0x6f1   :  { %v2035_v41 = vpop.eup %2034  ;;  %v1514_v25 = vadd.f32 %v3273_v6, %v1513_v53 }
 0x6f2   :  { %1590 = vmatmul.f32.gmra.mxu3 %v2035_v41 }
 0x6f3   :  { %2036 = vtanh.f32 %v1514_v25 }
 0x6f9   :  { %v2037_v39 = vpop.eup %2036 }
 0x6fa   :  { %1593 = vmatmul.f32.gmra.mxu3 %v2037_v39 }
 0x705   :  { %v1549_v48 = vpop.f32.mrf.mxu3 }
 0x706   :  { %v1550_v21 = vadd.f32 %v3328_v29, %v1549_v48 }
 0x708   :  { %v1661_v56 = vadd.f32 %v3448_v52, %v1550_v21 }
 0x70a   :  { %v1677_v60 = vmul.f32 0.16666667, %v1661_v56 }
 0x70c   :  { %v1693_v55 = vmul.f32 0.05, %v1677_v60 }
 0x70d   :  { %v1552_v10 = vpop.f32.mrf.mxu3 }
 0x70e   :  { %v1709_v33 = vadd.f32 %v3315_v4, %v1693_v55  ;;  %v1553_v3 = vadd.f32 %v3328_v29, %v1552_v10 }
 0x710   :  { %1741 = vst [vmem:[#allocation5 + $0x80] sm:$0xff] %v1709_v33  ;;  %v1662_v59 = vadd.f32 %v3454_v57, %v1553_v3 }
 0x712   :  { %v1678_v6 = vmul.f32 0.16666667, %v1662_v59 }
 0x714   :  { %v1694_v15 = vmul.f32 0.05, %v1678_v6 }
 0x715   :  { %v1555_v11 = vpop.f32.mrf.mxu3 }
 0x716   :  { %v1710_v38 = vadd.f32 %v3322_v43, %v1694_v15  ;;  %v1556_v14 = vadd.f32 %v3328_v29, %v1555_v11 }
 0x718   :  { %1742 = vst [vmem:[#allocation5 + $0x88] sm:$0xff] %v1710_v38  ;;  %v1663_v52 = vadd.f32 %v3460_v36, %v1556_v14 }
 0x71a   :  { %v1679_v31 = vmul.f32 0.16666667, %v1663_v52 }
 0x71c   :  { %v1695_v62 = vmul.f32 0.05, %v1679_v31 }
 0x71d   :  { %v1558_v50 = vpop.f32.mrf.mxu3 }
 0x71e   :  { %v1711_v4 = vadd.f32 %v3334_v8, %v1695_v62  ;;  %v1559_v5 = vadd.f32 %v3328_v29, %v1558_v50 }
 0x720   :  { %1743 = vst [vmem:[#allocation5 + $0x90] sm:$0xff] %v1711_v4  ;;  %v1664_v57 = vadd.f32 %v3466_v26, %v1559_v5 }
 0x722   :  { %v1680_v1 = vmul.f32 0.16666667, %v1664_v57 }
 0x724   :  { %v1696_v46 = vmul.f32 0.05, %v1680_v1 }
 0x725   :  { %v1561_v44 = vpop.f32.mrf.mxu3 }
 0x726   :  { %v1712_v43 = vadd.f32 %v3341_v58, %v1696_v46  ;;  %v1562_v27 = vadd.f32 %v3328_v29, %v1561_v44 }
 0x728   :  { %1744 = vst [vmem:[#allocation5 + $0x98] sm:$0xff] %v1712_v43  ;;  %v1665_v36 = vadd.f32 %v3472_v45, %v1562_v27 }
 0x72a   :  { %v1681_v24 = vmul.f32 0.16666667, %v1665_v36 }
 0x72c   :  { %v1697_v12 = vmul.f32 0.05, %v1681_v24 }
 0x72d   :  { %v1564_v47 = vpop.f32.mrf.mxu3 }
 0x72e   :  { %v1713_v8 = vadd.f32 %v3348_v51, %v1697_v12  ;;  %v1565_v37 = vadd.f32 %v3328_v29, %v1564_v47 }
 0x730   :  { %1745 = vst [vmem:[#allocation5 + $0xa0] sm:$0xff] %v1713_v8  ;;  %v1666_v26 = vadd.f32 %v3478_v22, %v1565_v37 }
 0x732   :  { %v1682_v9 = vmul.f32 0.16666667, %v1666_v26 }
 0x734   :  { %v1698_v53 = vmul.f32 0.05, %v1682_v9 }
 0x735   :  { %v1567_v41 = vpop.f32.mrf.mxu3 }
 0x736   :  { %v1714_v58 = vadd.f32 %v3355_v2, %v1698_v53  ;;  %v1568_v25 = vadd.f32 %v3328_v29, %v1567_v41 }
 0x738   :  { %1746 = vst [vmem:[#allocation5 + $0xa8] sm:$0xff] %v1714_v58  ;;  %v1667_v45 = vadd.f32 %v3484_v19, %v1568_v25 }
 0x73a   :  { %v1683_v39 = vmul.f32 0.16666667, %v1667_v45 }
 0x73c   :  { %v1699_v48 = vmul.f32 0.05, %v1683_v39 }
 0x73d   :  { %v1570_v21 = vpop.f32.mrf.mxu3 }
 0x73e   :  { %v1715_v51 = vadd.f32 %v3362_v54, %v1699_v48  ;;  %v1571_v56 = vadd.f32 %v3328_v29, %v1570_v21 }
 0x740   :  { %1747 = vst [vmem:[#allocation5 + $0xb0] sm:$0xff] %v1715_v51  ;;  %v1668_v22 = vadd.f32 %v3490_v7, %v1571_v56 }
 0x742   :  { %v1684_v60 = vmul.f32 0.16666667, %v1668_v22 }
 0x744   :  { %v1700_v55 = vmul.f32 0.05, %v1684_v60 }
 0x745   :  { %v1573_v10 = vpop.f32.mrf.mxu3 }
 0x746   :  { %v1716_v2 = vadd.f32 %v3369_v61, %v1700_v55  ;;  %v1574_v33 = vadd.f32 %v3328_v29, %v1573_v10 }
 0x748   :  { %1748 = vst [vmem:[#allocation5 + $0xb8] sm:$0xff] %v1716_v2  ;;  %v1669_v19 = vadd.f32 %v3496_v16, %v1574_v33 }
 0x74a   :  { %v1685_v3 = vmul.f32 0.16666667, %v1669_v19 }
 0x74c   :  { %v1701_v59 = vmul.f32 0.05, %v1685_v3 }
 0x74d   :  { %v1576_v6 = vpop.f32.mrf.mxu3 }
 0x74e   :  { %v1717_v54 = vadd.f32 %v3376_v30, %v1701_v59  ;;  %v1577_v15 = vadd.f32 %v3328_v29, %v1576_v6 }
 0x750   :  { %1749 = vst [vmem:[#allocation5 + $0xc0] sm:$0xff] %v1717_v54  ;;  %v1670_v7 = vadd.f32 %v3502_v28, %v1577_v15 }
 0x752   :  { %v1686_v11 = vmul.f32 0.16666667, %v1670_v7 }
 0x754   :  { %v1702_v38 = vmul.f32 0.05, %v1686_v11 }
 0x755   :  { %v1579_v14 = vpop.f32.mrf.mxu3 }
 0x756   :  { %v1718_v61 = vadd.f32 %v3383_v35, %v1702_v38  ;;  %v1580_v52 = vadd.f32 %v3328_v29, %v1579_v14 }
 0x758   :  { %1750 = vst [vmem:[#allocation5 + $0xc8] sm:$0xff] %v1718_v61  ;;  %v1671_v16 = vadd.f32 %v3508_v20, %v1580_v52 }
 0x75a   :  { %v1687_v31 = vmul.f32 0.16666667, %v1671_v16 }
 0x75c   :  { %v1703_v62 = vmul.f32 0.05, %v1687_v31 }
 0x75d   :  { %v1582_v50 = vpop.f32.mrf.mxu3 }
 0x75e   :  { %v1719_v30 = vadd.f32 %v3390_v40, %v1703_v62  ;;  %v1583_v4 = vadd.f32 %v3328_v29, %v1582_v50 }
 0x760   :  { %1751 = vst [vmem:[#allocation5 + $0xd0] sm:$0xff] %v1719_v30  ;;  %v1672_v28 = vadd.f32 %v3514_v17, %v1583_v4 }
 0x762   :  { %v1688_v5 = vmul.f32 0.16666667, %v1672_v28 }
 0x764   :  { %v1704_v57 = vmul.f32 0.05, %v1688_v5 }
 0x765   :  { %v1585_v1 = vpop.f32.mrf.mxu3 }
 0x766   :  { %v1720_v35 = vadd.f32 %v3397_v18, %v1704_v57  ;;  %v1586_v46 = vadd.f32 %v3328_v29, %v1585_v1 }
 0x768   :  { %1752 = vst [vmem:[#allocation5 + $0xd8] sm:$0xff] %v1720_v35  ;;  %v1673_v20 = vadd.f32 %v3520_v63, %v1586_v46 }
 0x76a   :  { %v1689_v44 = vmul.f32 0.16666667, %v1673_v20 }
 0x76c   :  { %v1705_v43 = vmul.f32 0.05, %v1689_v44 }
 0x76d   :  { %v1588_v27 = vpop.f32.mrf.mxu3 }
 0x76e   :  { %v1721_v40 = vadd.f32 %v3404_v42, %v1705_v43  ;;  %v1589_v36 = vadd.f32 %v3328_v29, %v1588_v27 }
 0x770   :  { %1753 = vst [vmem:[#allocation5 + $0xe0] sm:$0xff] %v1721_v40  ;;  %v1674_v17 = vadd.f32 %v3526_v13, %v1589_v36 }
 0x772   :  { %v1690_v24 = vmul.f32 0.16666667, %v1674_v17 }
 0x774   :  { %v1706_v12 = vmul.f32 0.05, %v1690_v24 }
 0x775   :  { %v1591_v47 = vpop.f32.mrf.mxu3 }
 0x776   :  { %v1722_v18 = vadd.f32 %v3411_v34, %v1706_v12  ;;  %v1592_v8 = vadd.f32 %v3328_v29, %v1591_v47 }
 0x778   :  { %1754 = vst [vmem:[#allocation5 + $0xe8] sm:$0xff] %v1722_v18  ;;  %v1675_v63 = vadd.f32 %v3532_v49, %v1592_v8 }
 0x77a   :  { %v1691_v37 = vmul.f32 0.16666667, %v1675_v63 }
 0x77c   :  { %v1707_v26 = vmul.f32 0.05, %v1691_v37 }
 0x77d   :  { %v1594_v9 = vpop.f32.mrf.mxu3 }
 0x77e   :  { %v1723_v42 = vadd.f32 %v3418_v23, %v1707_v26  ;;  %v1595_v53 = vadd.f32 %v3328_v29, %v1594_v9 }
 0x780   :  { %1755 = vst [vmem:[#allocation5 + $0xf0] sm:$0xff] %v1723_v42  ;;  %v1676_v13 = vadd.f32 %v3538_v0, %v1595_v53 }
 0x782   :  { %v1692_v41 = vmul.f32 0.16666667, %v1676_v13 }
 0x784   :  { %v1708_v34 = vmul.f32 0.05, %v1692_v41 }
 0x786   :  { %v1724_v49 = vadd.f32 %v3425_v32, %v1708_v34 }
 0x788   :  { %1756 = vst [vmem:[#allocation5 + $0xf8] sm:$0xff] %v1724_v49 }
 0x789   :  { %1769 = dma.vmem_to_hbm [thread:$0]  %s1762_s15, 4096, %s1764_s18, [#allocation4], %s2159_s23, %s2159_s23, %s2160_s24  }
 0x78a   :  { %2156 = dma.done.wait [#allocation4], 4096  }
 0x78b   :  { %2157 = vsyncadd [#allocation4], 4294963200 }
 0x78c   :  { %1774 = vsyncpa [#allocation3], 1 }
 0x78d   :  { %1775 = vsyncpa [#allocation4], 1 }

</bundles_post_ra>
